<compile_context>
chip_gen: v5e
topology: v5e:2x2
jax: 0.10.0
libtpu: 0.0.40
codegen_flags: <defaults>
</compile_context>

<pallas_src>
import jax
import jax.numpy as jnp
import numpy as np
from jax import lax
from jax.experimental import pallas as pl
from jax.experimental.pallas import tpu as pltpu


def _vgg_first3_kernel(xm_ref, xh_ref, w1_ref, b1_ref, w2_ref, b2_ref, o_ref):
    """One (batch, row-tile) grid step.

    xm_ref : (TH, W+2, K1p)  bf16  conv1 im2col, main (non-overlapping) row band
    xh_ref : (2,  W+2, K1p)  bf16  conv1 im2col, 2-row halo directly below the band
    w1_ref : (K1p, C1)       bf16  conv1 weights, rows ordered (dy, dx, ci), zero-padded to K1p
    b1_ref : (1, C1)         f32
    w2_ref : (C1, 9*C1)      bf16  conv2 weights, cols ordered (dy, dx, ci)
    b2_ref : (C1, 1)         f32
    o_ref  : (C1, TH*W)      f32   NCHW-native, lane-dense output slab
    """
    TH, Wp, _ = xm_ref.shape
    W = Wp - 2
    THp = TH + 2
    C1 = w2_ref.shape[0]

    t = pl.program_id(1)
    n_t = pl.num_programs(1)

    # ---- conv1 (features[0]) + ReLU (features[1]): one K-packed MXU matmul over the band ----
    xcol = jnp.concatenate([xm_ref[...], xh_ref[...]], axis=0)          # (THp, Wp, K1p)
    acc1 = jnp.dot(xcol.reshape(THp * Wp, xcol.shape[-1]), w1_ref[...],
                   preferred_element_type=jnp.float32)                  # (THp*Wp, C1)
    h1 = jnp.maximum(acc1 + b1_ref[...], 0.0)                           # f32 (v5e: no bf16 VPU)
    h1 = h1.reshape(THp, Wp, C1)

    # Zero the positions that are conv2's zero padding of the hidden activation:
    # border columns always; border rows only for the first/last row tile of the image.
    row = lax.broadcasted_iota(jnp.int32, (THp, Wp, 1), 0)
    col = lax.broadcasted_iota(jnp.int32, (THp, Wp, 1), 1)
    valid = (col >= 1) & (col <= W)
    valid &= (row >= 1) | (t > 0)
    valid &= (row <= TH) | (t < n_t - 1)
    h1e = jnp.where(valid, h1, 0.0).astype(jnp.bfloat16)                # (THp, Wp, C1)

    # ---- conv2 (features[2], no trailing ReLU): single K = 9*C1 = 576 matmul ---------------
    # Pack dx taps along the channel (lane) dim first (3 sublane-offset slices), then dy taps
    # along the free leading dim; K order (dy, dx, ci) matches w2_ref's columns.
    hcat = jnp.concatenate([h1e[:, dx:dx + W, :] for dx in range(3)], axis=-1)  # (THp, W, 3*C1)
    h1col = jnp.concatenate([hcat[dy:dy + TH] for dy in range(3)], axis=-1)     # (TH, W, 9*C1)
    h1col = h1col.reshape(TH * W, 9 * C1)

    # (C1, 9*C1) x (TH*W, 9*C1)^T -> (C1, TH*W): channel-major result, stored NCHW-native.
    acc2 = lax.dot_general(w2_ref[...], h1col,
                           dimension_numbers=(((1,), (1,)), ((), ())),
                           preferred_element_type=jnp.float32)
    o_ref[...] = (acc2 + b2_ref[...]).astype(o_ref.dtype)


def _pick_row_tile(H, W, target=32):
    """Largest even TH <= target that divides H and keeps the output slab lane-dense."""
    for th in range(min(H, target), 1, -1):
        if H % th == 0 and th % 2 == 0 and (th == H or (th * W) % 128 == 0):
            return th
    return H  # single-tile fallback


def vgg16_first3(x_nchw, w1_oihw, b1, w2_oihw, b2, *, row_tile=None,
                 vmem_limit_bytes=48 * 1024 * 1024):
    """x_nchw: (N, 3, H, W); weights in PyTorch OIHW layout. Returns (N, 64, H, W)."""
    N, Cin, H, W = x_nchw.shape
    C1 = w1_oihw.shape[0]
    TH = row_tile if row_tile is not None else _pick_row_tile(H, W)
    assert H % TH == 0, "row_tile must divide H"
    assert TH % 2 == 0, "row_tile must be even (2-row halo blocks)"
    nT = H // TH
    assert nT == 1 or (TH * W) % 128 == 0, "TH*W must be a multiple of 128 when row-tiling"
    Wp = W + 2
    K1 = 9 * Cin
    K1p = 32  # conv1 contraction (27) zero-padded to a packing-friendly 32

    # ---- plain-JAX glue: conv1 im2col (one fused XLA pass) + one-time weight repack ----
    x_nhwc = jnp.transpose(x_nchw, (0, 2, 3, 1))
    xp2 = jnp.pad(x_nhwc, ((0, 0), (2, 2), (2, 2), (0, 0)))             # (N, H+4, W+4, Cin)
    # im2col over the zero-padded hidden grid (H+2, W+2); tap order (dy, dx, ci).
    xcol = jnp.concatenate(
        [xp2[:, dy:dy + H + 2, dx:dx + W + 2, :] for dy in range(3) for dx in range(3)],
        axis=-1)                                                         # (N, H+2, W+2, 27)
    xcol = jnp.pad(xcol, ((0, 0), (0, 0), (0, 0), (0, K1p - K1))).astype(jnp.bfloat16)

    w1k = jnp.transpose(w1_oihw, (2, 3, 1, 0)).reshape(K1, C1)           # rows (dy, dx, ci)
    w1k = jnp.pad(w1k, ((0, K1p - K1), (0, 0))).astype(jnp.bfloat16)     # (K1p, C1)
    w2cm = jnp.transpose(w2_oihw, (0, 2, 3, 1)).reshape(C1, 9 * C1).astype(jnp.bfloat16)
    b1r = b1.reshape(1, C1).astype(jnp.float32)
    b2c = b2.reshape(C1, 1).astype(jnp.float32)

    cost = pl.CostEstimate(
        flops=2 * N * H * W * C1 * (K1 + 9 * C1),
        transcendentals=0,
        bytes_accessed=int(N * (H + 2) * Wp * K1p * 2 + K1p * C1 * 2 + C1 * 9 * C1 * 2
                           + 2 * C1 * 4 + N * C1 * H * W * 4),
    )

    out_flat = pl.pallas_call(
        _vgg_first3_kernel,
        out_shape=jax.ShapeDtypeStruct((N, C1, H * W), jnp.float32),
        grid_spec=pltpu.PrefetchScalarGridSpec(
            num_scalar_prefetch=0,
            grid=(N, nT),
            in_specs=[
                # Two views of the same im2col array: a non-overlapping TH-row band plus a 2-row
                # halo block, so no overlapping bands are ever materialized in HBM.
                pl.BlockSpec((None, TH, Wp, K1p), lambda n, t: (n, t, 0, 0)),
                pl.BlockSpec((None, 2, Wp, K1p), lambda n, t: (n, (t + 1) * (TH // 2), 0, 0)),
                pl.BlockSpec((K1p, C1), lambda n, t: (0, 0)),
                pl.BlockSpec((1, C1), lambda n, t: (0, 0)),
                pl.BlockSpec((C1, 9 * C1), lambda n, t: (0, 0)),
                pl.BlockSpec((C1, 1), lambda n, t: (0, 0)),
            ],
            out_specs=pl.BlockSpec((None, C1, TH * W), lambda n, t: (n, 0, t)),
        ),
        compiler_params=pltpu.CompilerParams(
            dimension_semantics=("parallel", "parallel"),
            vmem_limit_bytes=vmem_limit_bytes,   # ~30 MB/step at 224x224, TH=32 (v7x-safe)
        ),
        cost_estimate=cost,
    )(xcol, xcol, w1k, b1r, w2cm, b2c)

    # NCHW-native epilogue: a free reshape, no transpose, no extra HBM pass.
    return out_flat.reshape(N, C1, H, W).astype(x_nchw.dtype)


def _reference(x, w1, b1, w2, b2):
    """Plain-JAX reference matching PyTorch conv semantics (NCHW / OIHW), f32 throughout."""
    dn = ("NCHW", "OIHW", "NCHW")
    h = lax.conv_general_dilated(x, w1, (1, 1), ((1, 1), (1, 1)),
                                 dimension_numbers=dn) + b1.reshape(1, -1, 1, 1)
    h = jnp.maximum(h, 0.0)
    return lax.conv_general_dilated(h, w2, (1, 1), ((1, 1), (1, 1)),
                                    dimension_numbers=dn) + b2.reshape(1, -1, 1, 1)


if __name__ == "__main__":
    # Deterministic synthetic parameters (shapes dictated by VGG16 features[0] and features[2]).
    key = jax.random.PRNGKey(0)
    k_x, k_w1, k_b1, k_w2, k_b2 = jax.random.split(key, 5)

    N, Cin, H, W = 2, 3, 16, 16
    C1 = 64

    x = jax.random.normal(k_x, (N, Cin, H, W), jnp.float32)
    w1 = 0.1 * jax.random.normal(k_w1, (C1, Cin, 3, 3), jnp.float32)    # OIHW
    b1 = 0.1 * jax.random.normal(k_b1, (C1,), jnp.float32)
    w2 = 0.05 * jax.random.normal(k_w2, (C1, C1, 3, 3), jnp.float32)    # OIHW
    b2 = 0.1 * jax.random.normal(k_b2, (C1,), jnp.float32)

    # row_tile=8 exercises the multi-tile path (halo blocks + border masking) at this small H.
    out = jax.block_until_ready(vgg16_first3(x, w1, b1, w2, b2, row_tile=8))
    assert out.shape == (N, C1, H, W)

    ref = jax.block_until_ready(_reference(x, w1, b1, w2, b2))
    # bf16 matmul inputs / bf16 hidden activation with f32 accumulation -> loosened tolerance.
    np.testing.assert_allclose(np.asarray(out), np.asarray(ref), rtol=3e-2, atol=3e-2)

    print("KERNEL_OK")
</pallas_src>

<mosaic_0001>
module attributes {stable_mosaic.version = 11 : i64} {
  func.func @_vgg_first3_kernel(%arg0: i32, %arg1: i32, %arg2: memref<1x8x18x32xbf16, #tpu.memory_space<vmem>>, %arg3: memref<1x2x18x32xbf16, #tpu.memory_space<vmem>>, %arg4: memref<32x64xbf16, #tpu.memory_space<vmem>>, %arg5: memref<1x64xf32, #tpu.memory_space<vmem>>, %arg6: memref<64x576xbf16, #tpu.memory_space<vmem>>, %arg7: memref<64x1xf32, #tpu.memory_space<vmem>>, %arg8: memref<1x64x128xf32, #tpu.memory_space<vmem>>) attributes {dimension_semantics = [#tpu.dimension_semantics<parallel>, #tpu.dimension_semantics<parallel>], iteration_bounds = array<i64: 2, 2>, scalar_prefetch = 0 : i64, scratch_operands = 0 : i64, tpu.core_type = #tpu.core_type<tc>, window_params = [{transform_indices = @transform_0, window_bounds = array<i64: 1, 8, 18, 32>}, {transform_indices = @transform_1, window_bounds = array<i64: 1, 2, 18, 32>}, {pipeline_mode = #tpu.pipeline_mode<synchronous>, transform_indices = @transform_2, window_bounds = array<i64: 32, 64>}, {pipeline_mode = #tpu.pipeline_mode<synchronous>, transform_indices = @transform_3, window_bounds = array<i64: 1, 64>}, {pipeline_mode = #tpu.pipeline_mode<synchronous>, transform_indices = @transform_4, window_bounds = array<i64: 64, 576>}, {pipeline_mode = #tpu.pipeline_mode<synchronous>, transform_indices = @transform_5, window_bounds = array<i64: 64, 1>}, {transform_indices = @transform_6, window_bounds = array<i64: 1, 64, 128>}]} {
    %c0 = arith.constant 0 : index
    %c0_0 = arith.constant 0 : index
    %c0_1 = arith.constant 0 : index
    %c0_2 = arith.constant 0 : index
    %0 = vector.load %arg2[%c0, %c0_0, %c0_1, %c0_2] : memref<1x8x18x32xbf16, #tpu.memory_space<vmem>>, vector<1x8x18x32xbf16>
    %1 = vector.shape_cast %0 : vector<1x8x18x32xbf16> to vector<8x18x32xbf16>
    %c0_3 = arith.constant 0 : index
    %c0_4 = arith.constant 0 : index
    %c0_5 = arith.constant 0 : index
    %c0_6 = arith.constant 0 : index
    %2 = vector.load %arg3[%c0_3, %c0_4, %c0_5, %c0_6] : memref<1x2x18x32xbf16, #tpu.memory_space<vmem>>, vector<1x2x18x32xbf16>
    %3 = vector.shape_cast %2 : vector<1x2x18x32xbf16> to vector<2x18x32xbf16>
    %4 = tpu.concatenate %1, %3 in 0 : vector<8x18x32xbf16>, vector<2x18x32xbf16> -> vector<10x18x32xbf16>
    %5 = vector.shape_cast %4 : vector<10x18x32xbf16> to vector<180x32xbf16>
    %c0_7 = arith.constant 0 : index
    %c0_8 = arith.constant 0 : index
    %6 = vector.load %arg4[%c0_7, %c0_8] : memref<32x64xbf16, #tpu.memory_space<vmem>>, vector<32x64xbf16>
    %cst = arith.constant dense<0.000000e+00> : vector<180x64xf32>
    %7 = tpu.matmul %5, %6, %cst {dimension_numbers = #tpu.dot_dimension_numbers<[1], [0], [0], [1], [0, 0, 1, 1], [], []>} : vector<180x32xbf16>, vector<32x64xbf16>, vector<180x64xf32> -> vector<180x64xf32>
    %c0_9 = arith.constant 0 : index
    %c0_10 = arith.constant 0 : index
    %8 = vector.load %arg5[%c0_9, %c0_10] : memref<1x64xf32, #tpu.memory_space<vmem>>, vector<1x64xf32>
    %9 = vector.broadcast %8 : vector<1x64xf32> to vector<180x64xf32>
    %10 = arith.addf %7, %9 : vector<180x64xf32>
    %cst_11 = arith.constant 0.000000e+00 : f32
    %11 = vector.broadcast %cst_11 : f32 to vector<180x64xf32>
    %12 = arith.maximumf %10, %11 : vector<180x64xf32>
    %13 = vector.shape_cast %12 : vector<180x64xf32> to vector<10x18x64xf32>
    %14 = tpu.iota {dimensions = array<i32: 0>} : vector<10x18x1xi32>
    %15 = tpu.iota {dimensions = array<i32: 1>} : vector<10x18x1xi32>
    %c1_i32 = arith.constant 1 : i32
    %16 = vector.broadcast %c1_i32 : i32 to vector<10x18x1xi32>
    %17 = arith.cmpi sge, %15, %16 : vector<10x18x1xi32>
    %c16_i32 = arith.constant 16 : i32
    %18 = vector.broadcast %c16_i32 : i32 to vector<10x18x1xi32>
    %19 = arith.cmpi sle, %15, %18 : vector<10x18x1xi32>
    %20 = arith.andi %17, %19 : vector<10x18x1xi1>
    %c1_i32_12 = arith.constant 1 : i32
    %21 = vector.broadcast %c1_i32_12 : i32 to vector<10x18x1xi32>
    %22 = arith.cmpi sge, %14, %21 : vector<10x18x1xi32>
    %c0_i32 = arith.constant 0 : i32
    %23 = arith.cmpi sgt, %arg1, %c0_i32 : i32
    %24 = vector.broadcast %23 : i1 to vector<10x18x1xi1>
    %25 = arith.ori %22, %24 : vector<10x18x1xi1>
    %26 = arith.andi %20, %25 : vector<10x18x1xi1>
    %c8_i32 = arith.constant 8 : i32
    %27 = vector.broadcast %c8_i32 : i32 to vector<10x18x1xi32>
    %28 = arith.cmpi sle, %14, %27 : vector<10x18x1xi32>
    %c1_i32_13 = arith.constant 1 : i32
    %29 = arith.cmpi slt, %arg1, %c1_i32_13 : i32
    %30 = vector.broadcast %29 : i1 to vector<10x18x1xi1>
    %31 = arith.ori %28, %30 : vector<10x18x1xi1>
    %32 = arith.andi %26, %31 : vector<10x18x1xi1>
    %cst_14 = arith.constant 0.000000e+00 : f32
    %33 = vector.shape_cast %32 : vector<10x18x1xi1> to vector<10x18x1xi1>
    %34 = vector.broadcast %33 : vector<10x18x1xi1> to vector<10x18x64xi1>
    %35 = vector.broadcast %cst_14 : f32 to vector<10x18x64xf32>
    %36 = arith.select %34, %13, %35 : vector<10x18x64xi1>, vector<10x18x64xf32>
    %37 = arith.truncf %36 : vector<10x18x64xf32> to vector<10x18x64xbf16>
    %38 = vector.extract_strided_slice %37 {offsets = [0, 0, 0], sizes = [10, 16, 64], strides = [1, 1, 1]} : vector<10x18x64xbf16> to vector<10x16x64xbf16>
    %39 = vector.extract_strided_slice %37 {offsets = [0, 1, 0], sizes = [10, 16, 64], strides = [1, 1, 1]} : vector<10x18x64xbf16> to vector<10x16x64xbf16>
    %40 = vector.extract_strided_slice %37 {offsets = [0, 2, 0], sizes = [10, 16, 64], strides = [1, 1, 1]} : vector<10x18x64xbf16> to vector<10x16x64xbf16>
    %41 = tpu.concatenate %38, %39, %40 in 2 : vector<10x16x64xbf16>, vector<10x16x64xbf16>, vector<10x16x64xbf16> -> vector<10x16x192xbf16>
    %42 = vector.extract_strided_slice %41 {offsets = [0, 0, 0], sizes = [8, 16, 192], strides = [1, 1, 1]} : vector<10x16x192xbf16> to vector<8x16x192xbf16>
    %43 = vector.extract_strided_slice %41 {offsets = [1, 0, 0], sizes = [8, 16, 192], strides = [1, 1, 1]} : vector<10x16x192xbf16> to vector<8x16x192xbf16>
    %44 = vector.extract_strided_slice %41 {offsets = [2, 0, 0], sizes = [8, 16, 192], strides = [1, 1, 1]} : vector<10x16x192xbf16> to vector<8x16x192xbf16>
    %45 = tpu.concatenate %42, %43, %44 in 2 : vector<8x16x192xbf16>, vector<8x16x192xbf16>, vector<8x16x192xbf16> -> vector<8x16x576xbf16>
    %46 = vector.shape_cast %45 : vector<8x16x576xbf16> to vector<128x576xbf16>
    %c0_15 = arith.constant 0 : index
    %c0_16 = arith.constant 0 : index
    %47 = vector.load %arg6[%c0_15, %c0_16] : memref<64x576xbf16, #tpu.memory_space<vmem>>, vector<64x576xbf16>
    %cst_17 = arith.constant dense<0.000000e+00> : vector<64x128xf32>
    %48 = tpu.matmul %47, %46, %cst_17 {dimension_numbers = #tpu.dot_dimension_numbers<[1], [1], [0], [0], [0, 0, 1, 0], [], []>} : vector<64x576xbf16>, vector<128x576xbf16>, vector<64x128xf32> -> vector<64x128xf32>
    %c0_18 = arith.constant 0 : index
    %c0_19 = arith.constant 0 : index
    %49 = vector.load %arg7[%c0_18, %c0_19] : memref<64x1xf32, #tpu.memory_space<vmem>>, vector<64x1xf32>
    %50 = vector.broadcast %49 : vector<64x1xf32> to vector<64x128xf32>
    %51 = arith.addf %48, %50 : vector<64x128xf32>
    %c0_20 = arith.constant 0 : index
    %c0_21 = arith.constant 0 : index
    %c0_22 = arith.constant 0 : index
    %52 = vector.load %arg8[%c0_20, %c0_21, %c0_22] : memref<1x64x128xf32, #tpu.memory_space<vmem>>, vector<1x64x128xf32>
    %53 = vector.shape_cast %52 : vector<1x64x128xf32> to vector<64x128xf32>
    %54 = vector.shape_cast %51 : vector<64x128xf32> to vector<1x64x128xf32>
    tpu.vector_store %arg8[%c0_20, %c0_21, %c0_22], %54 {strides = array<i32>} : memref<1x64x128xf32, #tpu.memory_space<vmem>>, vector<1x64x128xf32>,
    return
  }
  func.func @transform_0(%arg0: i32, %arg1: i32) -> (i32, i32, i32, i32) {
    %c0_i32 = arith.constant 0 : i32
    %c0_i32_0 = arith.constant 0 : i32
    %c0_i32_1 = arith.constant 0 : i32
    return %arg0, %arg1, %c0_i32, %c0_i32_0 : i32, i32, i32, i32
  }
  func.func @transform_1(%arg0: i32, %arg1: i32) -> (i32, i32, i32, i32) {
    %c1_i32 = arith.constant 1 : i32
    %0 = arith.addi %arg1, %c1_i32 : i32
    %c4_i32 = arith.constant 4 : i32
    %1 = arith.muli %0, %c4_i32 : i32
    %c0_i32 = arith.constant 0 : i32
    %c0_i32_0 = arith.constant 0 : i32
    %c0_i32_1 = arith.constant 0 : i32
    return %arg0, %1, %c0_i32, %c0_i32_0 : i32, i32, i32, i32
  }
  func.func @transform_2(%arg0: i32, %arg1: i32) -> (i32, i32) {
    %c0_i32 = arith.constant 0 : i32
    %c0_i32_0 = arith.constant 0 : i32
    %c0_i32_1 = arith.constant 0 : i32
    return %c0_i32, %c0_i32_0 : i32, i32
  }
  func.func @transform_3(%arg0: i32, %arg1: i32) -> (i32, i32) {
    %c0_i32 = arith.constant 0 : i32
    %c0_i32_0 = arith.constant 0 : i32
    %c0_i32_1 = arith.constant 0 : i32
    return %c0_i32, %c0_i32_0 : i32, i32
  }
  func.func @transform_4(%arg0: i32, %arg1: i32) -> (i32, i32) {
    %c0_i32 = arith.constant 0 : i32
    %c0_i32_0 = arith.constant 0 : i32
    %c0_i32_1 = arith.constant 0 : i32
    return %c0_i32, %c0_i32_0 : i32, i32
  }
  func.func @transform_5(%arg0: i32, %arg1: i32) -> (i32, i32) {
    %c0_i32 = arith.constant 0 : i32
    %c0_i32_0 = arith.constant 0 : i32
    %c0_i32_1 = arith.constant 0 : i32
    return %c0_i32, %c0_i32_0 : i32, i32
  }
  func.func @transform_6(%arg0: i32, %arg1: i32) -> (i32, i32, i32) {
    %c0_i32 = arith.constant 0 : i32
    %c0_i32_0 = arith.constant 0 : i32
    return %arg0, %c0_i32, %arg1 : i32, i32, i32
  }
}

</mosaic_0001>

<bundles_post_ra>
// kernel: tpu_custom_call.1
= control target key start
LH: loop header
LB: loop body
LE: loop exit
PB: predicated region body
PF: predicated region fallthrough
CT: control target
= control target key end

     0   :  { %11 = vsyncpa [#allocation3], 0  ;;  %s3450_s0 = inlined_call_operand.vmem [shape: bf16[2,18,18,32], index: 0, kind: input, shape index: {}]   ;;  %s3451_s1 = inlined_call_operand.vmem [shape: bf16[2,18,18,32], index: 1, kind: input, shape index: {}]   ;;  %s3452_s2 = inlined_call_operand.vmem [shape: bf16[32,64], index: 2, kind: input, shape index: {}]   ;;  %s3453_s3 = inlined_call_operand.vmem [shape: f32[1,64], index: 3, kind: input, shape index: {}]   ;;  %s3454_s4 = inlined_call_operand.vmem [shape: bf16[64,576], index: 4, kind: input, shape index: {}]   ;;  %s3455_s5 = inlined_call_operand.vmem [shape: f32[64,1], index: 5, kind: input, shape index: {}]   ;;  %s3456_s6 = inlined_call_operand.hbm [shape: f32[2,64,256], index: 6, kind: output, shape index: {}]  }
   0x1   :  { %13 = vsyncpa [#allocation3 + $0x1], 0  ;;  %s2610_s21 = smov 0   ;;  %s2612_s22 = smov 0  }
   0x2   :  { %s2614_s23 = smov 0   ;;  %s2616_s24 = smov 0  }
   0x3   :  { %s2618_s25 = smov 0   ;;  %s2620_s26 = smov 0  }
   0x4   :  { %s2622_s27 = smov 0   ;;  %s2624_s28 = smov 0  }
   0x5 LB: > { %s2238_s29 = sadd.s32 4294967295, %s2568_s28   ;;  %s2239_s30 = sadd.s32 4294967294, %s2568_s28   ;;  %s2568_s28 = sphi %s2624_s28, %s19_s28   ;;  %s2564_s27 = sphi %s2622_s27, %s3471_s27   ;;  %s2560_s26 = sphi %s2620_s26, %s3470_s26   ;;  %s2556_s25 = sphi %s2618_s25, %s3469_s25   ;;  %s2552_s24 = sphi %s2616_s24, %s3468_s24   ;;  %s2548_s23 = sphi %s2614_s23, %s3467_s23   ;;  %s2544_s22 = sphi %s2612_s22, %s3466_s22   ;;  %s2540_s21 = sphi %s2610_s21, %s3465_s21  }
   0x6   : > { %s28_s7 = sadd.s32 1, %s2560_s26  ;;  %s31_s8 = sadd.s32 1, %s2564_s27 }
   0x7   : > { %p29_p0 = scmp.ge.s32.totalorder %s28_s7, 2  ;;  %p194_p1 = scmp.ne.s32.totalorder %s2548_s23, %s2544_s22 }
   0x8   : > { %p195_p2 = scmp.eq.s32.totalorder %s2238_s29, 3  ;;  %p200_p5 = scmp.ne.s32.totalorder %s2544_s22, %s2540_s21 }
   0x9   : > { %s3473_s7 = smov (%p29_p0, %s28_s7), 0  ;;  %s3475_s8 = smov (!%p29_p0, %s31_s8), %s2564_s27 }
   0xa   : > { %3459 = sst [smem:[#allocation5_spill]] %s3473_s7  ;;  %s180_s9 = ssub.s32 %s2560_s26, %s3473_s7 }
   0xb   : > { %p2661_p3 = por %p195_p2, %p194_p1  ;;  %p33_p4 = scmp.ge.s32.totalorder %s3475_s8, 2 }
   0xc   : > { %p201_p6 = scmp.eq.s32.totalorder %s2239_s30, 3  ;;  %p2244_p7 = scmp.ge.s32.totalorder %s2568_s28, 1 }
   0xd   : > { %s3477_s8 = smov (%p33_p4, %s3475_s8), 0  ;;  %p273_p9 = scmp.lt.s32.totalorder %s2568_s28, 5 }
   0xe   : > { %3461 = sst [smem:[#allocation6_spill]] %s3477_s8  ;;  %p2670_p8 = por %p201_p6, %p200_p5 }
   0xf   : > { %s179_s12 = ssub.s32 %s2564_s27, %s3477_s8  ;;  %s184_s13 = sadd.s32 1, %s2548_s23 }
  0x10   : > { %s181_s14 = sor.u32 %s180_s9, %s179_s12  ;;  %p274_p10 = pnand %p2244_p7, %p273_p9 }
  0x11   : > { %p182_p11 = scmp.eq.s32.totalorder %s181_s14, 0  ;;  %s2246_s18 = sshll.u32 (!%p274_p10), %s2552_s24, 3 }
  0x12   : > { %277 = sbr.rel (%p274_p10) target bundleno = 987 (0x3db), region = 44  ;;  %p331_p12 = scmp.lt.s32.totalorder (!%p274_p10), %s2556_s25, 1 }
  0x13   : > { %s2679_s15 = scalar_select %p182_p11, %s2548_s23, %s184_s13  }
  0x14   : > { %p333_p13 = scmp.lt.s32.totalorder (!%p274_p10), %s2246_s18, 17  ;;  %s2390_s13 = sadd.s32 (!%p274_p10), 8, %s2246_s18 }
  0x15   : > { %p351_p0 = scmp.lt.s32.totalorder (!%p274_p10), %s2390_s13, 17  ;;  %p1134_p1 = scmp.gt.s32.totalorder (!%p274_p10), %s2552_s24, 0 }
  0x16   : > { %p1144_p2 = scmp.lt.s32.totalorder (!%p274_p10), %s2552_s24, 1  ;;  %s322_s20 = sand.u32 (!%p274_p10), 1, %s2544_s22  }
  0x17   : > { %v2368_v0 = vld [vmem:[%s3452_s2 + $0x8] sm:$0xff]  ;;  %v2367_v1 = vld [vmem:[%s3452_s2] sm:$0xff]  ;;  %s2690_s29 = scalar_select %p331_p12, %s2556_s25, 1  ;;  %vm452_vm0 = vcmask 1040384   ;;  %vm456_vm1 = vcmask 1041409   ;;  %vm460_vm2 = vcmask 1042434  }
  0x18   : > { %946 = vmatpush.bf16.msra.mxu0 %v2368_v0  ;;  %s334_s30 = scalar_select %p333_p13, %s2246_s18, 17  ;;  %vm464_vm3 = vcmask 1043459   ;;  %vm915_vm4 = vcmask 261120   ;;  %vm1469_vm7 = vsmask.f32 7424  ;;  %vm1641_vm11 = vcmask 523264  }
  0x19   : > { %s2392_s9 = smul.u32 54, %s2690_s29  ;;  %s3479_s13 = smov (!%p351_p0, %s2390_s13), 17  ;;  %vm1610_vm12 = vcmask 1046528  }
  0x1a   : > { %s2391_s12 = smul.u32 3, %s334_s30  ;;  %s2245_s29 = sshll.u32 %s322_s20, 6 }
  0x1b   : > { %s2393_s8 = smul.u32 3, %s3479_s13  ;;  %s2117_s17 = scalar_lea.sflag [#allocation3], %s322_s20 }
  0x1c   : > { %947 = vmatpush.bf16.msra.mxu0 %v2367_v1  ;;  %s337_s14 = sadd.s32 %s2392_s9, %s2391_s12  ;;  %s2570_s12 = smov 64  }
  0x1d   : > { %s2247_s16 = sshll.u32 %s337_s14, 2  ;;  %s2712_s18 = sadd.s32 %s2393_s8, %s2392_s9 }
  0x1e   : > { %s2698_s7 = scalar_lea.vmem %s3450_s0, %s2247_s16  ;;  %s2250_s19 = sshll.u32 %s2712_s18, 2 }
  0x1f   : > { %v362_v2 = vld [vmem:[%s2698_s7] sm:$0xf]  ;;  %v363_v3 = vld [vmem:[%s2698_s7 + $0x4] sm:$0xf]  ;;  %v365_v20 = vld [vmem:[%s2698_s7 + $0xc] sm:$0xf]  ;;  %s2809_s30 = scalar_lea.vmem %s3451_s1, %s2250_s19 }
  0x20   : > { %v422_v4 = vrot.slane %v362_v2, 3  ;;  %v423_v5 = vrot.slane %v363_v3, 3  ;;  %v364_v21 = vld [vmem:[%s2698_s7 + $0x8] sm:$0x1]  ;;  %v425_v22 = vrot.slane %v365_v20, 3 }
  0x21   : > { %v366_v23 = vld [vmem:[%s2698_s7 + $0x10] sm:$0xf]  ;;  %v424_v24 = vrot.slane %v364_v21, 3  ;;  %v368_v40 = vld [vmem:[%s2698_s7 + $0x18] sm:$0xf] }
  0x22   : > { %v455_v6 = vsel %vm452_vm0, %v362_v2, %v422_v4  ;;  %v457_v7 = vsel %vm456_vm1, %v362_v2, %v422_v4  ;;  %v461_v8 = vsel %vm460_vm2, %v362_v2, %v422_v4  ;;  %v465_v9 = vsel %vm464_vm3, %v362_v2, %v422_v4  ;;  %v367_v41 = vld [vmem:[%s2698_s7 + $0x14] sm:$0x1]  ;;  %v369_v43 = vld [vmem:[%s2698_s7 + $0x1c] sm:$0xf]  ;;  %v371_v60 = vld [vmem:[%s2698_s7 + $0x24] sm:$0xf] }
  0x23   : > { %v459_v10 = vrot.slane %v457_v7, 1  ;;  %v463_v11 = vrot.slane %v461_v8, 2  ;;  %v467_v12 = vrot.slane %v465_v9, 3  ;;  %v470_v13 = vsel %vm452_vm0, %v363_v3, %v423_v5  ;;  %734 = vst [vmem:[#allocation1] ss:$9 sm:$0xff] %v455_v6 }
  0x24   : > { %v471_v14 = vsel %vm456_vm1, %v363_v3, %v423_v5  ;;  %v474_v15 = vsel %vm460_vm2, %v363_v3, %v423_v5  ;;  %v477_v16 = vsel %vm464_vm3, %v363_v3, %v423_v5  ;;  %745 = vst [vmem:[#allocation1 + $0x4] ss:$9 sm:$0xff] %v470_v13  ;;  %v426_v25 = vrot.slane %v366_v23, 3  ;;  %v370_v61 = vld [vmem:[%s2698_s7 + $0x20] sm:$0x1] }
  0x25   : > { %v473_v17 = vrot.slane %v471_v14, 1  ;;  %v476_v18 = vrot.slane %v474_v15, 2  ;;  %737 = vst [vmem:[#allocation1 + $0x1] ss:$9 sm:$0xff] %v459_v10  ;;  %v479_v19 = vrot.slane %v477_v16, 3  ;;  %v486_v26 = vsel %vm456_vm1, %v365_v20, %v425_v22 }
  0x26   : > { %740 = vst [vmem:[#allocation1 + $0x2] ss:$9 sm:$0xff] %v463_v11  ;;  %v489_v27 = vsel %vm460_vm2, %v365_v20, %v425_v22  ;;  %v482_v28 = vsel %vm452_vm0, %v364_v21, %v424_v24  ;;  %v492_v29 = vsel %vm464_vm3, %v365_v20, %v425_v22  ;;  %v485_v30 = vsel %vm452_vm0, %v365_v20, %v425_v22  ;;  %v372_v3 = vld [vmem:[%s2698_s7 + $0x28] sm:$0xf]  ;;  %v374_v16 = vld [vmem:[%s2698_s7 + $0x30] sm:$0xf] }
  0x27   : > { %743 = vst [vmem:[#allocation1 + $0x3] ss:$9 sm:$0xff] %v467_v12  ;;  %v488_v31 = vrot.slane %v486_v26, 1  ;;  %v491_v33 = vrot.slane %v489_v27, 2  ;;  %v498_v34 = vsel %vm456_vm1, %v366_v23, %v426_v25  ;;  %v494_v35 = vrot.slane %v492_v29, 3 }
  0x28   : > { %748 = vst [vmem:[#allocation1 + $0x5] ss:$9 sm:$0xff] %v473_v17  ;;  %v501_v36 = vsel %vm460_vm2, %v366_v23, %v426_v25  ;;  %v497_v37 = vsel %vm452_vm0, %v366_v23, %v426_v25  ;;  %v500_v38 = vrot.slane %v498_v34, 1  ;;  %v428_v42 = vrot.slane %v368_v40, 3  ;;  %v373_v17 = vld [vmem:[%s2698_s7 + $0x2c] sm:$0x1] }
  0x29   : > { %751 = vst [vmem:[#allocation1 + $0x6] ss:$9 sm:$0xff] %v476_v18  ;;  %v503_v39 = vrot.slane %v501_v36, 2  ;;  %v504_v44 = vsel %vm464_vm3, %v366_v23, %v426_v25  ;;  %v427_v45 = vrot.slane %v367_v41, 3  ;;  %v429_v46 = vrot.slane %v369_v43, 3 }
  0x2a   : > { %754 = vst [vmem:[#allocation1 + $0x7] ss:$9 sm:$0xff] %v479_v19  ;;  %v506_v47 = vrot.slane %v504_v44, 3  ;;  %v513_v48 = vsel %vm456_vm1, %v368_v40, %v428_v42  ;;  %v516_v49 = vsel %vm460_vm2, %v368_v40, %v428_v42  ;;  %v519_v51 = vsel %vm464_vm3, %v368_v40, %v428_v42  ;;  %v375_v34 = vld [vmem:[%s2698_s7 + $0x34] sm:$0xf] }
  0x2b   : > { %v509_v50 = vsel %vm452_vm0, %v367_v41, %v427_v45  ;;  %v512_v53 = vsel %vm452_vm0, %v368_v40, %v428_v42  ;;  %v515_v54 = vrot.slane %v513_v48, 1  ;;  %v518_v55 = vrot.slane %v516_v49, 2  ;;  %s1135_s13 = scalar_select %p1134_p1, 1, 0 }
  0x2c   : > { %v525_v56 = vsel %vm456_vm1, %v369_v43, %v429_v46  ;;  %v521_v57 = vrot.slane %v519_v51, 3  ;;  %v524_v58 = vsel %vm452_vm0, %v369_v43, %v429_v46  ;;  %v431_v62 = vrot.slane %v371_v60, 3  ;;  %s1145_s14 = scalar_select %p1144_p2, 1, 0 }
  0x2d   : > { %v527_v59 = vrot.slane %v525_v56, 1  ;;  %v528_v63 = vsel %vm460_vm2, %v369_v43, %v429_v46  ;;  %v531_v0 = vsel %vm464_vm3, %v369_v43, %v429_v46  ;;  %v430_v1 = vrot.slane %v370_v61, 3 }
  0x2e   : > { %v530_v2 = vrot.slane %v528_v63, 2  ;;  %v533_v4 = vrot.slane %v531_v0, 3  ;;  %v540_v5 = vsel %vm456_vm1, %v371_v60, %v431_v62  ;;  %v543_v6 = vsel %vm460_vm2, %v371_v60, %v431_v62 }
  0x2f   : > { %v536_v8 = vsel %vm452_vm0, %v370_v61, %v430_v1  ;;  %v546_v9 = vsel %vm464_vm3, %v371_v60, %v431_v62  ;;  %v432_v10 = vrot.slane %v372_v3, 3  ;;  %v539_v11 = vsel %vm452_vm0, %v371_v60, %v431_v62 }
  0x30   : > { %v542_v12 = vrot.slane %v540_v5, 1  ;;  %v545_v13 = vrot.slane %v543_v6, 2  ;;  %v548_v14 = vrot.slane %v546_v9, 3  ;;  %v434_v19 = vrot.slane %v374_v16, 3 }
  0x31   : > { %v755_v32 = vld [vmem:[#allocation1] sm:$0xff]  ;;  %v551_v15 = vsel %vm452_vm0, %v372_v3, %v432_v10  ;;  %v552_v18 = vsel %vm456_vm1, %v372_v3, %v432_v10  ;;  %v555_v20 = vsel %vm460_vm2, %v372_v3, %v432_v10  ;;  %v558_v21 = vsel %vm464_vm3, %v372_v3, %v432_v10 }
  0x32   : > { %2259 = vmatmul.msk.bf16.vlgmr.msra.gmra.mxu0 %vm915_vm4, %v755_v32  ;;  %756 = vst [vmem:[#allocation1] ss:$9 sm:$0xff] %v482_v28  ;;  %v433_v22 = vrot.slane %v373_v17, 3  ;;  %v554_v23 = vrot.slane %v552_v18, 1  ;;  %v557_v24 = vrot.slane %v555_v20, 2  ;;  %v560_v25 = vrot.slane %v558_v21, 3 }
  0x33   : > { %757 = vst [vmem:[#allocation1 + $0x1] ss:$9 sm:$0xff] %v485_v30  ;;  %v567_v26 = vsel %vm456_vm1, %v374_v16, %v434_v19  ;;  %v570_v28 = vsel %vm460_vm2, %v374_v16, %v434_v19  ;;  %v573_v30 = vsel %vm464_vm3, %v374_v16, %v434_v19  ;;  %v435_v36 = vrot.slane %v375_v34, 3  ;;  %v383_v18 = vld [vmem:[%s2698_s7 + $0x54] sm:$0xf] }
  0x34   : > { %759 = vst [vmem:[#allocation1 + $0x2] ss:$9 sm:$0xff] %v488_v31  ;;  %v563_v29 = vsel %vm452_vm0, %v373_v17, %v433_v22  ;;  %v566_v31 = vsel %vm452_vm0, %v374_v16, %v434_v19  ;;  %v569_v32 = vrot.slane %v567_v26, 1  ;;  %v443_v26 = vrot.slane %v383_v18, 3 }
  0x35   : > { %761 = vst [vmem:[#allocation1 + $0x3] ss:$9 sm:$0xff] %v491_v33  ;;  %v572_v33 = vrot.slane %v570_v28, 2  ;;  %v582_v41 = vsel %vm460_vm2, %v375_v34, %v435_v36  ;;  %v585_v42 = vsel %vm464_vm3, %v375_v34, %v435_v36  ;;  %v578_v44 = vsel %vm452_vm0, %v375_v34, %v435_v36 }
  0x36   : > { %763 = vst [vmem:[#allocation1 + $0x4] ss:$9 sm:$0xff] %v494_v35  ;;  %v575_v35 = vrot.slane %v573_v30, 3  ;;  %v584_v46 = vrot.slane %v582_v41, 2  ;;  %v587_v48 = vrot.slane %v585_v42, 3  ;;  %v647_v30 = vsel %vm452_vm0, %v383_v18, %v443_v26 }
  0x37   : > { %764 = vst [vmem:[#allocation1 + $0x5] ss:$9 sm:$0xff] %v497_v37  ;;  %v377_v37 = vld [vmem:[%s2698_s7 + $0x3c] sm:$0xf] }
  0x38   : > { %766 = vst [vmem:[#allocation1 + $0x6] ss:$9 sm:$0xff] %v500_v38  ;;  %v376_v38 = vld [vmem:[%s2698_s7 + $0x38] sm:$0x1]  ;;  %v437_v40 = vrot.slane %v377_v37, 3 }
  0x39   : > { %768 = vst [vmem:[#allocation1 + $0x7] ss:$9 sm:$0xff] %v503_v39  ;;  %v579_v39 = vsel %vm456_vm1, %v375_v34, %v435_v36  ;;  %v436_v43 = vrot.slane %v376_v38, 3  ;;  %v651_v34 = vsel %vm460_vm2, %v383_v18, %v443_v26 }
  0x3a   : > { %v581_v45 = vrot.slane %v579_v39, 1  ;;  %v594_v49 = vsel %vm456_vm1, %v377_v37, %v437_v40 }
  0x3b   : > { %v590_v51 = vsel %vm452_vm0, %v376_v38, %v436_v43  ;;  %v653_v38 = vrot.slane %v651_v34, 2 }
  0x40   : > { %v769_v52 = vld [vmem:[#allocation1] sm:$0xff] }
  0x41   : > { %771 = vst [vmem:[#allocation1] ss:$9 sm:$0xff] %v506_v47 }
  0x42   : > { %2260 = vmatmul.msk.bf16.gmra.mxu0 %vm915_vm4, %v769_v52  ;;  %772 = vst [vmem:[#allocation1 + $0x1] ss:$9 sm:$0xff] %v509_v50  ;;  %v597_v50 = vsel %vm460_vm2, %v377_v37, %v437_v40  ;;  %v593_v52 = vsel %vm452_vm0, %v377_v37, %v437_v40 }
  0x43   : > { %773 = vst [vmem:[#allocation1 + $0x2] ss:$9 sm:$0xff] %v512_v53  ;;  %v596_v53 = vrot.slane %v594_v49, 1  ;;  %v386_v49 = vld [vmem:[%s2809_s30] sm:$0xf] }
  0x44   : > { %775 = vst [vmem:[#allocation1 + $0x3] ss:$9 sm:$0xff] %v515_v54  ;;  %v599_v54 = vrot.slane %v597_v50, 2 }
  0x45   : > { %777 = vst [vmem:[#allocation1 + $0x4] ss:$9 sm:$0xff] %v518_v55  ;;  %v378_v55 = vld [vmem:[%s2698_s7 + $0x40] sm:$0xf] }
  0x46   : > { %779 = vst [vmem:[#allocation1 + $0x5] ss:$9 sm:$0xff] %v521_v57  ;;  %v438_v56 = vrot.slane %v378_v55, 3  ;;  %v380_v57 = vld [vmem:[%s2698_s7 + $0x48] sm:$0xf] }
  0x47   : > { %780 = vst [vmem:[#allocation1 + $0x6] ss:$9 sm:$0xff] %v524_v58  ;;  %v600_v58 = vsel %vm464_vm3, %v377_v37, %v437_v40  ;;  %v440_v61 = vrot.slane %v380_v57, 3  ;;  %v385_v37 = vld [vmem:[%s2698_s7 + $0x5c] sm:$0x1] }
  0x48   : > { %782 = vst [vmem:[#allocation1 + $0x7] ss:$9 sm:$0xff] %v527_v59  ;;  %v379_v59 = vld [vmem:[%s2698_s7 + $0x44] sm:$0x1]  ;;  %v606_v60 = vsel %vm456_vm1, %v378_v55, %v438_v56  ;;  %v602_v62 = vrot.slane %v600_v58, 3  ;;  %v609_v63 = vsel %vm460_vm2, %v378_v55, %v438_v56  ;;  %v612_v0 = vsel %vm464_vm3, %v378_v55, %v438_v56 }
  0x49   : > { %v439_v1 = vrot.slane %v379_v59, 3  ;;  %v608_v3 = vrot.slane %v606_v60, 1  ;;  %v611_v5 = vrot.slane %v609_v63, 2  ;;  %v614_v6 = vrot.slane %v612_v0, 3 }
  0x4a   : > { %v620_v9 = vsel %vm452_vm0, %v380_v57, %v440_v61 }
  0x4f   : > { %v783_v7 = vld [vmem:[#allocation1] sm:$0xff] }
  0x50   : > { %785 = vst [vmem:[#allocation1] ss:$9 sm:$0xff] %v530_v2  ;;  %v605_v2 = vsel %vm452_vm0, %v378_v55, %v438_v56 }
  0x51   : > { %787 = vst [vmem:[#allocation1 + $0x1] ss:$9 sm:$0xff] %v533_v4 }
  0x52   : > { %2261 = vmatmul.msk.bf16.gmra.mxu0 %vm915_vm4, %v783_v7  ;;  %788 = vst [vmem:[#allocation1 + $0x2] ss:$9 sm:$0xff] %v536_v8  ;;  %v621_v7 = vsel %vm456_vm1, %v380_v57, %v440_v61  ;;  %v617_v8 = vsel %vm452_vm0, %v379_v59, %v439_v1 }
  0x53   : > { %789 = vst [vmem:[#allocation1 + $0x3] ss:$9 sm:$0xff] %v539_v11  ;;  %v623_v10 = vrot.slane %v621_v7, 1  ;;  %v381_v11 = vld [vmem:[%s2698_s7 + $0x4c] sm:$0xf] }
  0x54   : > { %791 = vst [vmem:[#allocation1 + $0x4] ss:$9 sm:$0xff] %v542_v12  ;;  %v441_v12 = vrot.slane %v381_v11, 3  ;;  %v388_v7 = vld [vmem:[%s2809_s30 + $0x8] sm:$0x1] }
  0x55   : > { %793 = vst [vmem:[#allocation1 + $0x5] ss:$9 sm:$0xff] %v545_v13  ;;  %v624_v13 = vsel %vm460_vm2, %v380_v57, %v440_v61 }
  0x56   : > { %795 = vst [vmem:[#allocation1 + $0x6] ss:$9 sm:$0xff] %v548_v14  ;;  %v627_v14 = vsel %vm464_vm3, %v380_v57, %v440_v61  ;;  %v626_v16 = vrot.slane %v624_v13, 2  ;;  %v633_v17 = vsel %vm456_vm1, %v381_v11, %v441_v12  ;;  %v636_v20 = vsel %vm460_vm2, %v381_v11, %v441_v12 }
  0x57   : > { %796 = vst [vmem:[#allocation1 + $0x7] ss:$9 sm:$0xff] %v551_v15  ;;  %v382_v15 = vld [vmem:[%s2698_s7 + $0x50] sm:$0x1]  ;;  %v629_v19 = vrot.slane %v627_v14, 3  ;;  %v639_v21 = vsel %vm464_vm3, %v381_v11, %v441_v12 }
  0x58   : > { %v641_v28 = vrot.slane %v639_v21, 3 }
  0x5e   : > { %v797_v27 = vld [vmem:[#allocation1] sm:$0xff] }
  0x5f   : > { %799 = vst [vmem:[#allocation1] ss:$9 sm:$0xff] %v554_v23  ;;  %v442_v23 = vrot.slane %v382_v15, 3 }
  0x60   : > { %801 = vst [vmem:[#allocation1 + $0x1] ss:$9 sm:$0xff] %v557_v24  ;;  %v632_v24 = vsel %vm452_vm0, %v381_v11, %v441_v12 }
  0x61   : > { %803 = vst [vmem:[#allocation1 + $0x2] ss:$9 sm:$0xff] %v560_v25  ;;  %v635_v25 = vrot.slane %v633_v17, 1 }
  0x62   : > { %2262 = vmatmul.msk.bf16.gmra.mxu0 %vm915_vm4, %v797_v27  ;;  %804 = vst [vmem:[#allocation1 + $0x3] ss:$9 sm:$0xff] %v563_v29  ;;  %v638_v27 = vrot.slane %v636_v20, 2  ;;  %v644_v29 = vsel %vm452_vm0, %v382_v15, %v442_v23 }
  0x63   : > { %805 = vst [vmem:[#allocation1 + $0x4] ss:$9 sm:$0xff] %v566_v31  ;;  %v384_v31 = vld [vmem:[%s2698_s7 + $0x58] sm:$0xf]  ;;  %s2356_s7 = sshll.u32 %s2556_s25, 4 }
  0x64   : > { %807 = vst [vmem:[#allocation1 + $0x5] ss:$9 sm:$0xff] %v569_v32  ;;  %v444_v32 = vrot.slane %v384_v31, 3  ;;  %s2127_s9 = sadd.s32 %s2552_s24, %s2356_s7  ;;  %s2494_s7 = scalar_lea.hbm %s3456_s6, 256 }
  0x65   : > { %809 = vst [vmem:[#allocation1 + $0x6] ss:$9 sm:$0xff] %v572_v33  ;;  %v648_v33 = vsel %vm456_vm1, %v383_v18, %v443_v26 }
  0x66   : > { %811 = vst [vmem:[#allocation1 + $0x7] ss:$9 sm:$0xff] %v575_v35  ;;  %v654_v35 = vsel %vm464_vm3, %v383_v18, %v443_v26  ;;  %v650_v36 = vrot.slane %v648_v33, 1  ;;  %v660_v39 = vsel %vm456_vm1, %v384_v31, %v444_v32  ;;  %v663_v41 = vsel %vm460_vm2, %v384_v31, %v444_v32 }
  0x67   : > { %v656_v40 = vrot.slane %v654_v35, 3  ;;  %v666_v43 = vsel %vm464_vm3, %v384_v31, %v444_v32 }
  0x6d   : > { %v812_v47 = vld [vmem:[#allocation1] sm:$0xff] }
  0x6e   : > { %813 = vst [vmem:[#allocation1] ss:$9 sm:$0xff] %v578_v44  ;;  %v445_v44 = vrot.slane %v385_v37, 3 }
  0x6f   : > { %815 = vst [vmem:[#allocation1 + $0x1] ss:$9 sm:$0xff] %v581_v45  ;;  %v659_v45 = vsel %vm452_vm0, %v384_v31, %v444_v32 }
  0x70   : > { %817 = vst [vmem:[#allocation1 + $0x2] ss:$9 sm:$0xff] %v584_v46  ;;  %v662_v46 = vrot.slane %v660_v39, 1  ;;  %v671_v50 = vsel %vm452_vm0, %v385_v37, %v445_v44 }
  0x71   : > { %819 = vst [vmem:[#allocation1 + $0x3] ss:$9 sm:$0xff] %v587_v48  ;;  %v668_v48 = vrot.slane %v666_v43, 3 }
  0x72   : > { %2263 = vmatmul.msk.bf16.gmra.mxu0 %vm915_vm4, %v812_v47  ;;  %820 = vst [vmem:[#allocation1 + $0x4] ss:$9 sm:$0xff] %v590_v51  ;;  %v665_v47 = vrot.slane %v663_v41, 2  ;;  %v446_v51 = vrot.slane %v386_v49, 3 }
  0x73   : > { %821 = vst [vmem:[#allocation1 + $0x5] ss:$9 sm:$0xff] %v593_v52  ;;  %v387_v52 = vld [vmem:[%s2809_s30 + $0x4] sm:$0xf] }
  0x74   : > { %823 = vst [vmem:[#allocation1 + $0x6] ss:$9 sm:$0xff] %v596_v53  ;;  %v447_v53 = vrot.slane %v387_v52, 3  ;;  %v678_v55 = vsel %vm460_vm2, %v386_v49, %v446_v51  ;;  %v681_v56 = vsel %vm464_vm3, %v386_v49, %v446_v51  ;;  %v674_v57 = vsel %vm452_vm0, %v386_v49, %v446_v51 }
  0x75   : > { %825 = vst [vmem:[#allocation1 + $0x7] ss:$9 sm:$0xff] %v599_v54  ;;  %v675_v54 = vsel %vm456_vm1, %v386_v49, %v446_v51  ;;  %v680_v59 = vrot.slane %v678_v55, 2 }
  0x76   : > { %v677_v58 = vrot.slane %v675_v54, 1  ;;  %v687_v60 = vsel %vm456_vm1, %v387_v52, %v447_v53  ;;  %v690_v63 = vsel %vm460_vm2, %v387_v52, %v447_v53  ;;  %v693_v0 = vsel %vm464_vm3, %v387_v52, %v447_v53 }
  0x77   : > { %v686_v1 = vsel %vm452_vm0, %v387_v52, %v447_v53 }
  0x7c   : > { %v826_v4 = vld [vmem:[#allocation1] sm:$0xff] }
  0x7d   : > { %828 = vst [vmem:[#allocation1] ss:$9 sm:$0xff] %v602_v62  ;;  %v683_v62 = vrot.slane %v681_v56, 3 }
  0x7e   : > { %829 = vst [vmem:[#allocation1 + $0x1] ss:$9 sm:$0xff] %v605_v2  ;;  %v689_v2 = vrot.slane %v687_v60, 1 }
  0x7f   : > { %831 = vst [vmem:[#allocation1 + $0x2] ss:$9 sm:$0xff] %v608_v3  ;;  %v692_v3 = vrot.slane %v690_v63, 2 }
  0x80   : > { %833 = vst [vmem:[#allocation1 + $0x3] ss:$9 sm:$0xff] %v611_v5  ;;  %v695_v5 = vrot.slane %v693_v0, 3 }
  0x81   : > { %835 = vst [vmem:[#allocation1 + $0x4] ss:$9 sm:$0xff] %v614_v6 }
  0x82   : > { %2264 = vmatmul.msk.bf16.gmra.mxu0 %vm915_vm4, %v826_v4  ;;  %836 = vst [vmem:[#allocation1 + $0x5] ss:$9 sm:$0xff] %v617_v8  ;;  %v389_v4 = vld [vmem:[%s2809_s30 + $0xc] sm:$0xf] }
  0x83   : > { %837 = vst [vmem:[#allocation1 + $0x6] ss:$9 sm:$0xff] %v620_v9  ;;  %v449_v8 = vrot.slane %v389_v4, 3  ;;  %v390_v9 = vld [vmem:[%s2809_s30 + $0x10] sm:$0xf] }
  0x84   : > { %839 = vst [vmem:[#allocation1 + $0x7] ss:$9 sm:$0xff] %v623_v10  ;;  %v448_v10 = vrot.slane %v388_v7, 3  ;;  %v450_v11 = vrot.slane %v390_v9, 3 }
  0x85   : > { %v702_v12 = vsel %vm456_vm1, %v389_v4, %v449_v8  ;;  %v705_v13 = vsel %vm460_vm2, %v389_v4, %v449_v8  ;;  %v708_v15 = vsel %vm464_vm3, %v389_v4, %v449_v8  ;;  %v701_v17 = vsel %vm452_vm0, %v389_v4, %v449_v8 }
  0x86   : > { %v698_v14 = vsel %vm452_vm0, %v388_v7, %v448_v10  ;;  %v704_v18 = vrot.slane %v702_v12, 1  ;;  %v714_v20 = vsel %vm456_vm1, %v390_v9, %v450_v11  ;;  %v717_v23 = vsel %vm460_vm2, %v390_v9, %v450_v11 }
  0x87   : > { %v719_v26 = vrot.slane %v717_v23, 2  ;;  %v720_v31 = vsel %vm464_vm3, %v390_v9, %v450_v11 }
  0x88   : > { %v722_v34 = vrot.slane %v720_v31, 3 }
  0x8b   : > { %v840_v22 = vld [vmem:[#allocation1] sm:$0xff] }
  0x8c   : > { %842 = vst [vmem:[#allocation1] ss:$9 sm:$0xff] %v626_v16 }
  0x8d   : > { %844 = vst [vmem:[#allocation1 + $0x1] ss:$9 sm:$0xff] %v629_v19  ;;  %v707_v19 = vrot.slane %v705_v13, 2 }
  0x8e   : > { %845 = vst [vmem:[#allocation1 + $0x2] ss:$9 sm:$0xff] %v632_v24  ;;  %v713_v24 = vsel %vm452_vm0, %v390_v9, %v450_v11 }
  0x8f   : > { %847 = vst [vmem:[#allocation1 + $0x3] ss:$9 sm:$0xff] %v635_v25  ;;  %v716_v25 = vrot.slane %v714_v20, 1 }
  0x90   : > { %849 = vst [vmem:[#allocation1 + $0x4] ss:$9 sm:$0xff] %v638_v27  ;;  %v2839_v27 = vld [vmem:[%s3453_s3] ss:$0 sm:$0xff] }
  0x91   : > { %851 = vst [vmem:[#allocation1 + $0x5] ss:$9 sm:$0xff] %v641_v28 }
  0x92   : > { %2265 = vmatmul.msk.bf16.gmra.mxu0 %vm915_vm4, %v840_v22  ;;  %852 = vst [vmem:[#allocation1 + $0x6] ss:$9 sm:$0xff] %v644_v29  ;;  %v710_v22 = vrot.slane %v708_v15, 3  ;;  %v391_v29 = vld [vmem:[%s2809_s30 + $0x14] sm:$0x1]  ;;  %s3390_s30 = scalar_lea.vmem [#allocation2], %s2245_s29 }
  0x93   : > { %853 = vst [vmem:[#allocation1 + $0x7] ss:$9 sm:$0xff] %v647_v30  ;;  %v451_v32 = vrot.slane %v391_v29, 3  ;;  %s2130_s16 = sshll.u32 %s3390_s30, 4  ;;  %s2131_s16 = int_to_ptr.vmem [resolvable:$true] %s2130_s16 }
  0x9a   : > { %v854_v42 = vld [vmem:[#allocation1] sm:$0xff] }
  0x9b   : > { %856 = vst [vmem:[#allocation1] ss:$9 sm:$0xff] %v650_v36  ;;  %v725_v36 = vsel %vm452_vm0, %v391_v29, %v451_v32 }
  0x9c   : > { %858 = vst [vmem:[#allocation1 + $0x1] ss:$9 sm:$0xff] %v653_v38 }
  0x9d   : > { %860 = vst [vmem:[#allocation1 + $0x2] ss:$9 sm:$0xff] %v656_v40 }
  0x9e   : > { %861 = vst [vmem:[#allocation1 + $0x3] ss:$9 sm:$0xff] %v659_v45 }
  0x9f   : > { %863 = vst [vmem:[#allocation1 + $0x4] ss:$9 sm:$0xff] %v662_v46 }
  0xa0   : > { %865 = vst [vmem:[#allocation1 + $0x5] ss:$9 sm:$0xff] %v665_v47 }
  0xa1   : > { %867 = vst [vmem:[#allocation1 + $0x6] ss:$9 sm:$0xff] %v668_v48 }
  0xa2   : > { %2266 = vmatmul.msk.bf16.gmra.mxu0 %vm915_vm4, %v854_v42  ;;  %868 = vst [vmem:[#allocation1 + $0x7] ss:$9 sm:$0xff] %v671_v50 }
  0xa9   : > { %v869_v61 = vld [vmem:[#allocation1] sm:$0xff] }
  0xaa   : > { %870 = vst [vmem:[#allocation1] ss:$9 sm:$0xff] %v674_v57 }
  0xab   : > { %872 = vst [vmem:[#allocation1 + $0x1] ss:$9 sm:$0xff] %v677_v58 }
  0xac   : > { %874 = vst [vmem:[#allocation1 + $0x2] ss:$9 sm:$0xff] %v680_v59 }
  0xad   : > { %876 = vst [vmem:[#allocation1 + $0x3] ss:$9 sm:$0xff] %v683_v62 }
  0xae   : > { %877 = vst [vmem:[#allocation1 + $0x4] ss:$9 sm:$0xff] %v686_v1 }
  0xaf   : > { %v949_v6 = vpop.f32.mrf.mxu0  ;;  %879 = vst [vmem:[#allocation1 + $0x5] ss:$9 sm:$0xff] %v689_v2 }
  0xb0   : > { %881 = vst [vmem:[#allocation1 + $0x6] ss:$9 sm:$0xff] %v692_v3  ;;  %v950_v35 = vadd.f32 %v2839_v27, %v949_v6 }
  0xb1   : > { %883 = vst [vmem:[#allocation1 + $0x7] ss:$9 sm:$0xff] %v695_v5 }
  0xb2   : > { %2267 = vmatmul.msk.bf16.gmra.mxu0 %vm915_vm4, %v869_v61  ;;  %v1008_v43 = vmax.f32 %v950_v35, 0.0 }
  0xb4   : > { %v1054_v45 = vrot.slane %v1008_v43, 2  ;;  %v1055_v46 = vrot.slane %v1008_v43, 4  ;;  %v1056_v48 = vrot.slane %v1008_v43, 6 }
  0xb7   : > { %v951_v16 = vpop.f32.mrf.mxu0 }
  0xb8   : > { %v884_v21 = vld [vmem:[#allocation1] sm:$0xff]  ;;  %v952_v28 = vadd.f32 %v2839_v27, %v951_v16 }
  0xb9   : > { %885 = vst [vmem:[#allocation1] ss:$9 sm:$0xff] %v698_v14 }
  0xba   : > { %886 = vst [vmem:[#allocation1 + $0x1] ss:$9 sm:$0xff] %v701_v17  ;;  %v1009_v33 = vmax.f32 %v952_v28, 0.0 }
  0xbb   : > { %888 = vst [vmem:[#allocation1 + $0x2] ss:$9 sm:$0xff] %v704_v18 }
  0xbc   : > { %890 = vst [vmem:[#allocation1 + $0x3] ss:$9 sm:$0xff] %v707_v19  ;;  %v1057_v37 = vrot.slane %v1009_v33, 2  ;;  %v1058_v40 = vrot.slane %v1009_v33, 4  ;;  %v1059_v41 = vrot.slane %v1009_v33, 6 }
  0xbd   : > { %892 = vst [vmem:[#allocation1 + $0x4] ss:$9 sm:$0xff] %v710_v22 }
  0xbe   : > { %893 = vst [vmem:[#allocation1 + $0x5] ss:$9 sm:$0xff] %v713_v24 }
  0xbf   : > { %895 = vst [vmem:[#allocation1 + $0x6] ss:$9 sm:$0xff] %v716_v25  ;;  %v954_v30 = vpop.f32.mrf.mxu0 }
  0xc0   : > { %897 = vst [vmem:[#allocation1 + $0x7] ss:$9 sm:$0xff] %v719_v26  ;;  %v955_v42 = vadd.f32 %v2839_v27, %v954_v30 }
  0xc2   : > { %2268 = vmatmul.msk.bf16.gmra.mxu0 %vm915_vm4, %v884_v21  ;;  %v1010_v44 = vmax.f32 %v955_v42, 0.0 }
  0xc4   : > { %v1060_v51 = vrot.slane %v1010_v44, 2  ;;  %v1061_v52 = vrot.slane %v1010_v44, 4  ;;  %v1062_v53 = vrot.slane %v1010_v44, 6 }
  0xc7   : > { %v898_v38 = vld [vmem:[#allocation1] sm:$0xff]  ;;  %v956_v39 = vpop.f32.mrf.mxu0 }
  0xc8   : > { %900 = vst [vmem:[#allocation1] ss:$9 sm:$0xff] %v722_v34  ;;  %v957_v50 = vadd.f32 %v2839_v27, %v956_v39 }
  0xc9   : > { %901 = vst [vmem:[#allocation1 + $0x1] ss:$9 sm:$0xff] %v725_v36 }
  0xca   : > { %1180 = vst [vmem:[#allocation1 + $0x20] ss:$4 sm:$0xff] %v1009_v33  ;;  %v1011_v55 = vmax.f32 %v957_v50, 0.0 }
  0xcb   : > { %1182 = vst [vmem:[#allocation1 + $0x21] ss:$4 sm:$0xff] %v1057_v37 }
  0xcc   : > { %1184 = vst [vmem:[#allocation1 + $0x22] ss:$4 sm:$0xff] %v1058_v40  ;;  %v1063_v0 = vrot.slane %v1011_v55, 2  ;;  %v1064_v3 = vrot.slane %v1011_v55, 4  ;;  %v1065_v4 = vrot.slane %v1011_v55, 6 }
  0xcd   : > { %1186 = vst [vmem:[#allocation1 + $0x23] ss:$4 sm:$0xff] %v1059_v41 }
  0xcf   : > { %v959_v47 = vpop.f32.mrf.mxu0 }
  0xd0   : > { %v902_v49 = vld [vmem:[#allocation1] sm:$0xff]  ;;  %v960_v56 = vadd.f32 %v2839_v27, %v959_v47 }
  0xd1   : > { %1172 = vst [vmem:[#allocation1] ss:$4 sm:$0xff] %v1008_v43 }
  0xd2   : > { %1174 = vst [vmem:[#allocation1 + $0x1] ss:$4 sm:$0xff] %v1054_v45  ;;  %2269 = vmatmul.msk.bf16.gmra.mxu0 %vm915_vm4, %v898_v38  ;;  %v1012_v58 = vmax.f32 %v960_v56, 0.0  ;;  %v1121_v56 = vlaneseq }
  0xd3   : > { %1176 = vst [vmem:[#allocation1 + $0x2] ss:$4 sm:$0xff] %v1055_v46 }
  0xd4   : > { %1178 = vst [vmem:[#allocation1 + $0x3] ss:$4 sm:$0xff] %v1056_v48  ;;  %v2850_v54 = vld.sshfl [vmem:[#allocation1 + $0x20] sm:$0xff pattern:$0x73625140]  ;;  %v1066_v60 = vrot.slane %v1012_v58, 2 }
  0xd5   : > { %1191 = vst [vmem:[#allocation1 + $0x20] ss:$4 sm:$0xff] %v1060_v51  ;;  %v1067_v13 = vrot.slane %v1012_v58, 4  ;;  %v1068_v15 = vrot.slane %v1012_v58, 6 }
  0xd6   : > { %1192 = vst [vmem:[#allocation1 + $0x21] ss:$4 sm:$0xff] %v1061_v52 }
  0xd7   : > { %1193 = vst [vmem:[#allocation1 + $0x22] ss:$4 sm:$0xff] %v1062_v53  ;;  %v961_v57 = vpop.f32.mrf.mxu0 }
  0xd8   : > { %1194 = vst [vmem:[#allocation1 + $0x23] ss:$4 sm:$0xff] %v1011_v55  ;;  %v962_v61 = vadd.f32 %v2839_v27, %v961_v57 }
  0xda   : > { %v1013_v1 = vmax.f32 %v962_v61, 0.0  ;;  %v2878_v61 = vshrl.u32 %v1121_v56, 7 }
  0xdb   : > { %v2853_v59 = vld.sshfl [vmem:[#allocation1] sm:$0xff pattern:$0x73625140] }
  0xdc   : > { %1189 = vst [vmem:[#allocation1] ss:$4 sm:$0xff] %v1010_v44  ;;  %v1070_v7 = vrot.slane %v1013_v1, 4  ;;  %v1071_v8 = vrot.slane %v1013_v1, 6  ;;  %v1069_v17 = vrot.slane %v1013_v1, 2  ;;  %vm1125_vm5 = vcmp.ge.s32.totalorder %v2878_v61, 1 }
  0xdf   : > { %v2856_v62 = vld.sshfl [vmem:[#allocation1 + $0x20] sm:$0xff pattern:$0x73625140]  ;;  %v964_v63 = vpop.f32.mrf.mxu0 }
  0xe0   : > { %1200 = vst [vmem:[#allocation1 + $0x20] ss:$4 sm:$0xff] %v1066_v60  ;;  %v965_v2 = vadd.f32 %v2839_v27, %v964_v63 }
  0xe2   : > { %2270 = vmatmul.msk.bf16.gmra.mxu0 %vm915_vm4, %v902_v49  ;;  %v1014_v6 = vmax.f32 %v965_v2, 0.0 }
  0xe3   : > { %v2860_v5 = vld.sshfl [vmem:[#allocation1] sm:$0xff pattern:$0x73625140] }
  0xe4   : > { %1196 = vst [vmem:[#allocation1] ss:$4 sm:$0xff] %v1063_v0  ;;  %v1072_v10 = vrot.slane %v1014_v6, 2  ;;  %v1074_v19 = vrot.slane %v1014_v6, 6  ;;  %v1073_v24 = vrot.slane %v1014_v6, 4 }
  0xe5   : > { %1197 = vst [vmem:[#allocation1 + $0x1] ss:$4 sm:$0xff] %v1064_v3 }
  0xe6   : > { %1198 = vst [vmem:[#allocation1 + $0x2] ss:$4 sm:$0xff] %v1065_v4 }
  0xe7   : > { %1199 = vst [vmem:[#allocation1 + $0x3] ss:$4 sm:$0xff] %v1012_v58  ;;  %v2862_v9 = vld.sshfl [vmem:[#allocation1 + $0x20] sm:$0xff pattern:$0x73625140]  ;;  %v966_v11 = vpop.f32.mrf.mxu0 }
  0xe8   : > { %1207 = vst [vmem:[#allocation1 + $0x20] ss:$4 sm:$0xff] %v1070_v7  ;;  %v967_v12 = vadd.f32 %v2839_v27, %v966_v11 }
  0xe9   : > { %1208 = vst [vmem:[#allocation1 + $0x21] ss:$4 sm:$0xff] %v1071_v8 }
  0xea   : > { %1209 = vst [vmem:[#allocation1 + $0x22] ss:$4 sm:$0xff] %v1014_v6  ;;  %v1015_v14 = vmax.f32 %v967_v12, 0.0 }
  0xeb   : > { %1210 = vst [vmem:[#allocation1 + $0x23] ss:$4 sm:$0xff] %v1072_v10 }
  0xec   : > { %v1075_v20 = vrot.slane %v1015_v14, 2  ;;  %v1076_v22 = vrot.slane %v1015_v14, 4  ;;  %v1077_v31 = vrot.slane %v1015_v14, 6 }
  0xee   : > { %v2865_v16 = vld.sshfl [vmem:[#allocation1] sm:$0xff pattern:$0x73625140] }
  0xef   : > { %1203 = vst [vmem:[#allocation1] ss:$4 sm:$0xff] %v1067_v13  ;;  %v969_v18 = vpop.f32.mrf.mxu0 }
  0xf0   : > { %1204 = vst [vmem:[#allocation1 + $0x1] ss:$4 sm:$0xff] %v1068_v15  ;;  %v970_v23 = vadd.f32 %v2839_v27, %v969_v18 }
  0xf1   : > { %1205 = vst [vmem:[#allocation1 + $0x2] ss:$4 sm:$0xff] %v1013_v1  ;;  %v2881_v1 = vadd.s32 16, %v2878_v61 }
  0xf2   : > { %1206 = vst [vmem:[#allocation1 + $0x3] ss:$4 sm:$0xff] %v1069_v17  ;;  %v2867_v21 = vld.sshfl [vmem:[#allocation1 + $0x20] sm:$0xff pattern:$0x73625140]  ;;  %v1016_v25 = vmax.f32 %v970_v23, 0.0 }
  0xf3   : > { %1215 = vst [vmem:[#allocation1 + $0x20] ss:$4 sm:$0xff] %v1074_v19  ;;  %vm1130_vm6 = vcmp.le.s32.totalorder %v2881_v1, 16 }
  0xf4   : > { %1216 = vst [vmem:[#allocation1 + $0x21] ss:$4 sm:$0xff] %v1015_v14  ;;  %v1080_v29 = vrot.slane %v1016_v25, 6  ;;  %v1078_v33 = vrot.slane %v1016_v25, 2  ;;  %v1079_v36 = vrot.slane %v1016_v25, 4 }
  0xf5   : > { %1217 = vst [vmem:[#allocation1 + $0x22] ss:$4 sm:$0xff] %v1075_v20 }
  0xf6   : > { %1218 = vst [vmem:[#allocation1 + $0x23] ss:$4 sm:$0xff] %v1076_v22 }
  0xf7   : > { %v971_v26 = vpop.f32.mrf.mxu0 }
  0xf8   : > { %v972_v37 = vadd.f32 %v2839_v27, %v971_v26 }
  0xf9   : > { %v2870_v28 = vld.sshfl [vmem:[#allocation1] sm:$0xff pattern:$0x73625140] }
  0xfa   : > { %1213 = vst [vmem:[#allocation1] ss:$4 sm:$0xff] %v1073_v24  ;;  %v1017_v43 = vmax.f32 %v972_v37, 0.0 }
  0xfc   : > { %v1081_v46 = vrot.slane %v1017_v43, 2  ;;  %v1082_v48 = vrot.slane %v1017_v43, 4  ;;  %v1083_v50 = vrot.slane %v1017_v43, 6 }
  0xfd   : > { %v1219_v30 = vld.sshfl [vmem:[#allocation1 + $0x20] sm:$0xff pattern:$0x73625140] }
  0xfe   : > { %1224 = vst [vmem:[#allocation1 + $0x20] ss:$4 sm:$0xff] %v1080_v29  ;;  %v1338_v10 = vsel %vm1125_vm5, %v1219_v30, 0.0 }
  0xff   : > { %v974_v32 = vpop.f32.mrf.mxu0  ;;  %v1368_v20 = vpack.c.bf16 %v1338_v10, %v1338_v10 }
 0x100   : > { %v975_v34 = vadd.f32 %v2839_v27, %v974_v32 }
 0x101   : > { %v2873_v35 = vld.sshfl [vmem:[#allocation1] sm:$0xff pattern:$0x73625140] }
 0x102   : > { %1220 = vst [vmem:[#allocation1] ss:$4 sm:$0xff] %v1077_v31  ;;  %v1018_v38 = vmax.f32 %v975_v34, 0.0 }
 0x103   : > { %1221 = vst [vmem:[#allocation1 + $0x1] ss:$4 sm:$0xff] %v1016_v25 }
 0x104   : > { %1222 = vst [vmem:[#allocation1 + $0x2] ss:$4 sm:$0xff] %v1078_v33  ;;  %v1084_v39 = vrot.slane %v1018_v38, 2  ;;  %v1085_v40 = vrot.slane %v1018_v38, 4  ;;  %v1086_v42 = vrot.slane %v1018_v38, 6  ;;  %v1415_v33 = vunpack.c.l.b16 %v1368_v20 }
 0x105   : > { %1223 = vst [vmem:[#allocation1 + $0x3] ss:$4 sm:$0xff] %v1079_v36  ;;  %v1226_v41 = vld.sshfl [vmem:[#allocation1 + $0x20] sm:$0xff pattern:$0x73625140] }
 0x106   : > { %1231 = vst [vmem:[#allocation1 + $0x20] ss:$4 sm:$0xff] %v1018_v38  ;;  %v1340_v15 = vsel %vm1130_vm6, %v1226_v41, 0.0 }
 0x107   : > { %1232 = vst [vmem:[#allocation1 + $0x21] ss:$4 sm:$0xff] %v1084_v39  ;;  %v976_v44 = vpop.f32.mrf.mxu0  ;;  %v1370_v25 = vpack.c.bf16 %v1340_v15, %v1340_v15 }
 0x108   : > { %1233 = vst [vmem:[#allocation1 + $0x22] ss:$4 sm:$0xff] %v1085_v40  ;;  %v977_v45 = vadd.f32 %v2839_v27, %v976_v44 }
 0x109   : > { %1234 = vst [vmem:[#allocation1 + $0x23] ss:$4 sm:$0xff] %v1086_v42  ;;  %v1452_v38 = vunpack.c.l.b16 %v1370_v25 }
 0x10a   : > { %v1019_v47 = vmax.f32 %v977_v45, 0.0 }
 0x10c   : > { %v1225_v49 = vld.sshfl [vmem:[#allocation1] sm:$0xff pattern:$0x73625140]  ;;  %v1087_v51 = vrot.slane %v1019_v47, 2  ;;  %v1088_v52 = vrot.slane %v1019_v47, 4  ;;  %v1089_v53 = vrot.slane %v1019_v47, 6 }
 0x10d   : > { %1227 = vst [vmem:[#allocation1] ss:$4 sm:$0xff] %v1017_v43  ;;  %v1369_v12 = vpack.c.bf16 %v1225_v49, %v1225_v49 }
 0x10e   : > { %1228 = vst [vmem:[#allocation1 + $0x1] ss:$4 sm:$0xff] %v1081_v46 }
 0x10f   : > { %1229 = vst [vmem:[#allocation1 + $0x2] ss:$4 sm:$0xff] %v1082_v48  ;;  %v979_v55 = vpop.f32.mrf.mxu0  ;;  %v1416_v26 = vunpack.c.l.b16 %v1369_v12 }
 0x110   : > { %1230 = vst [vmem:[#allocation1 + $0x3] ss:$4 sm:$0xff] %v1083_v50  ;;  %v1236_v57 = vld.sshfl [vmem:[#allocation1 + $0x20] sm:$0xff pattern:$0x73625140]  ;;  %v980_v58 = vadd.f32 %v2839_v27, %v979_v55 }
 0x111   : > { %1239 = vst [vmem:[#allocation1 + $0x20] ss:$4 sm:$0xff] %v1087_v51  ;;  %v1372_v63 = vpack.c.bf16 %v1236_v57, %v1236_v57  ;;  %v2900_v37 = vpack.c.b16 %v1416_v26, %v1415_v33 }
 0x112   : > { %1240 = vst [vmem:[#allocation1 + $0x21] ss:$4 sm:$0xff] %v1088_v52  ;;  %v1020_v60 = vmax.f32 %v980_v58, 0.0 }
 0x113   : > { %1241 = vst [vmem:[#allocation1 + $0x22] ss:$4 sm:$0xff] %v1089_v53  ;;  %v1418_v7 = vunpack.c.l.b16 %v1372_v63  ;;  %v1509_v48 = vshll.u32 %v2900_v37, 16 }
 0x114   : > { %1242 = vst [vmem:[#allocation1 + $0x23] ss:$4 sm:$0xff] %v1020_v60  ;;  %v1090_v13 = vrot.slane %v1020_v60, 2  ;;  %v1091_v17 = vrot.slane %v1020_v60, 4  ;;  %v1092_v22 = vrot.slane %v1020_v60, 6 }
 0x115   : > { %v1511_v58 = vrot.slane %v1509_v48, 1 }
 0x117   : > { %v981_v0 = vpop.f32.mrf.mxu0  ;;  %v1235_v2 = vld.sshfl [vmem:[#allocation1] sm:$0xff pattern:$0x73625140] }
 0x118   : > { %v982_v3 = vadd.f32 %v2839_v27, %v981_v0  ;;  %1237 = vst [vmem:[#allocation1] ss:$4 sm:$0xff] %v1019_v47  ;;  %v1341_v4 = vsel %vm1125_vm5, %v1235_v2, 0.0  ;;  %v2908_v47 = vpack.c.b16 %v1452_v38, %v1452_v38  ;;  %v1507_v2 = vshrl.u32 %v2900_v37, 16 }
 0x119   : > { %v1371_v6 = vpack.c.bf16 %v1341_v4, %v1341_v4 }
 0x11a   : > { %v1021_v8 = vmax.f32 %v982_v3, 0.0  ;;  %v1514_v60 = vshll.u32 %v2908_v47, 16  ;;  %v1512_v3 = vor.u32 %v1511_v58, %v1507_v2 }
 0x11b   : > { %v1417_v11 = vunpack.c.l.b16 %v1371_v6  ;;  %v2892_v18 = vld.sshfl [vmem:[#allocation1 + $0x20] sm:$0xff pattern:$0x73625140] }
 0x11c   : > { %v1093_v14 = vrot.slane %v1021_v8, 2  ;;  %v1094_v50 = vrot.slane %v1021_v8, 4  ;;  %v1095_v56 = vrot.slane %v1021_v8, 6  ;;  %v1516_v4 = vrot.slane %v1514_v60, 1 }
 0x11d   : > { %v2894_v19 = vpack.c.b16 %v1418_v7, %v1417_v11 }
 0x11e   : > { %1248 = vst [vmem:[#allocation1 + $0x20] ss:$4 sm:$0xff] %v1093_v14  ;;  %v1517_v10 = vsel %vm1469_vm7, %v1512_v3, %v1516_v4 }
 0x11f   : > { %v984_v23 = vpop.f32.mrf.mxu0  ;;  %v1238_v24 = vld.sshfl [vmem:[#allocation1] sm:$0xff pattern:$0x73625140]  ;;  %v1521_v32 = vshll.u32 %v2894_v19, 16  ;;  %v1519_v44 = vshrl.u32 %v2894_v19, 16 }
 0x120   : > { %v985_v29 = vadd.f32 %v2839_v27, %v984_v23  ;;  %v1343_v30 = vsel %vm1130_vm6, %v1238_v24, 0.0  ;;  %1244 = vst [vmem:[#allocation1] ss:$4 sm:$0xff] %v1090_v13 }
 0x121   : > { %v1373_v31 = vpack.c.bf16 %v1343_v30, %v1343_v30  ;;  %1245 = vst [vmem:[#allocation1 + $0x1] ss:$4 sm:$0xff] %v1091_v17  ;;  %v1523_v43 = vrot.slane %v1521_v32, 1 }
 0x122   : > { %v1022_v34 = vmax.f32 %v985_v29, 0.0  ;;  %1246 = vst [vmem:[#allocation1 + $0x2] ss:$4 sm:$0xff] %v1092_v22 }
 0x123   : > { %v1453_v36 = vunpack.c.l.b16 %v1373_v31  ;;  %1247 = vst [vmem:[#allocation1 + $0x3] ss:$4 sm:$0xff] %v1021_v8  ;;  %v1524_v51 = vor.u32 %v1523_v43, %v1519_v44  ;;  %v1344_v31 = vsel %vm1125_vm5, %v2892_v18, 0.0 }
 0x124   : > { %v1097_v39 = vrot.slane %v1022_v34, 4  ;;  %v1098_v40 = vrot.slane %v1022_v34, 6  ;;  %v1096_v63 = vrot.slane %v1022_v34, 2 }
 0x125   : > { %v2902_v41 = vld.sshfl [vmem:[#allocation1 + $0x20] sm:$0xff pattern:$0x73625140]  ;;  %v2904_v42 = vpack.c.b16 %v1453_v36, %v1453_v36 }
 0x126   : > { %1255 = vst [vmem:[#allocation1 + $0x20] ss:$4 sm:$0xff] %v1097_v39  ;;  %v1346_v38 = vsel %vm1130_vm6, %v2902_v41, 0.0 }
 0x127   : > { %1256 = vst [vmem:[#allocation1 + $0x21] ss:$4 sm:$0xff] %v1098_v40  ;;  %v1526_v45 = vshll.u32 %v2904_v42, 16  ;;  %v986_v46 = vpop.f32.mrf.mxu0  ;;  %v1374_v40 = vpack.c.bf16 %v1344_v31, %v1344_v31  ;;  %v1376_v18 = vpack.c.bf16 %v1346_v38, %v1346_v38 }
 0x128   : > { %v987_v49 = vadd.f32 %v2839_v27, %v986_v46 }
 0x129   : > { %v1528_v52 = vrot.slane %v1526_v45, 1  ;;  %v1419_v41 = vunpack.c.l.b16 %v1374_v40 }
 0x12a   : > { %v1023_v53 = vmax.f32 %v987_v49, 0.0  ;;  %v1249_v55 = vld.sshfl [vmem:[#allocation1] sm:$0xff pattern:$0x73625140] }
 0x12b   : > { %v1529_v57 = vsel %vm1469_vm7, %v1524_v51, %v1528_v52  ;;  %1251 = vst [vmem:[#allocation1] ss:$4 sm:$0xff] %v1094_v50 }
 0x12c   : > { %1598 = vrot.lane.b32.xlu2 %v1529_v57, %s2570_s12  ;;  %v1099_v0 = vrot.slane %v1023_v53, 2  ;;  %1257 = vst [vmem:[#allocation1 + $0x22] ss:$4 sm:$0xff] %v1023_v53  ;;  %v1101_v11 = vrot.slane %v1023_v53, 6  ;;  %v1100_v15 = vrot.slane %v1023_v53, 4  ;;  %v1335_v53 = vsel %vm1125_vm5, %v2870_v28, 0.0 }
 0x12d   : > { %1252 = vst [vmem:[#allocation1 + $0x1] ss:$4 sm:$0xff] %v1095_v56  ;;  %v1366_v56 = vpack.c.bf16 %v2867_v21, %v2867_v21  ;;  %v1365_v2 = vpack.c.bf16 %v1335_v53, %v1335_v53 }
 0x12e   : > { %1258 = vst [vmem:[#allocation1 + $0x23] ss:$4 sm:$0xff] %v1099_v0 }
 0x12f   : > { %v989_v6 = vpop.f32.mrf.mxu0  ;;  %1253 = vst [vmem:[#allocation1 + $0x2] ss:$4 sm:$0xff] %v1022_v34  ;;  %v1375_v34 = vpack.c.bf16 %v1249_v55, %v1249_v55  ;;  %v1337_v55 = vsel %vm1130_vm6, %v2873_v35, 0.0  ;;  %v1414_v35 = vunpack.c.l.b16 %v1366_v56 }
 0x130   : > { %v990_v7 = vadd.f32 %v2839_v27, %v989_v6  ;;  %1254 = vst [vmem:[#allocation1 + $0x3] ss:$4 sm:$0xff] %v1096_v63  ;;  %v1454_v63 = vunpack.c.l.b16 %v1376_v18 }
 0x131   : > { %v1420_v49 = vunpack.c.l.b16 %v1375_v34 }
 0x132   : > { %v1024_v8 = vmax.f32 %v990_v7, 0.0  ;;  %v1367_v7 = vpack.c.bf16 %v1337_v55, %v1337_v55 }
 0x133   : > { %v2944_v60 = vpack.c.b16 %v1420_v49, %v1419_v41 }
 0x134   : > { %1596 = vrot.lane.b32.xlu2 %v1517_v10, %s2570_s12  ;;  %v1102_v12 = vrot.slane %v1024_v8, 2  ;;  %v1103_v14 = vrot.slane %v1024_v8, 4  ;;  %v1104_v36 = vrot.slane %v1024_v8, 6  ;;  %v2951_v10 = vpack.c.b16 %v1454_v63, %v1454_v63 }
 0x135   : > { %v1260_v13 = vld.sshfl [vmem:[#allocation1 + $0x20] sm:$0xff pattern:$0x73625140] }
 0x136   : > { %1263 = vst [vmem:[#allocation1 + $0x20] ss:$4 sm:$0xff] %v1101_v11  ;;  %v1378_v17 = vpack.c.bf16 %v1260_v13, %v1260_v13  ;;  %v1533_v11 = vshll.u32 %v2944_v60, 16 }
 0x137   : > { %1264 = vst [vmem:[#allocation1 + $0x21] ss:$4 sm:$0xff] %v1024_v8  ;;  %v991_v20 = vpop.f32.mrf.mxu0  ;;  %v1259_v22 = vld.sshfl [vmem:[#allocation1] sm:$0xff pattern:$0x73625140] }
 0x138   : > { %1265 = vst [vmem:[#allocation1 + $0x22] ss:$4 sm:$0xff] %v1102_v12  ;;  %v992_v23 = vadd.f32 %v2839_v27, %v991_v20  ;;  %v1347_v24 = vsel %vm1125_vm5, %v1259_v22, 0.0  ;;  %v1422_v26 = vunpack.c.l.b16 %v1378_v17 }
 0x139   : > { %1266 = vst [vmem:[#allocation1 + $0x23] ss:$4 sm:$0xff] %v1103_v14  ;;  %v1377_v25 = vpack.c.bf16 %v1347_v24, %v1347_v24  ;;  %v1413_v14 = vunpack.c.l.b16 %v1365_v2 }
 0x13a   : > { %v1025_v29 = vmax.f32 %v992_v23, 0.0  ;;  %1261 = vst [vmem:[#allocation1] ss:$4 sm:$0xff] %v1100_v15 }
 0x13b   : > { %v1421_v30 = vunpack.c.l.b16 %v1377_v25  ;;  %v2954_v22 = vpack.c.b16 %v1414_v35, %v1413_v14  ;;  %v1535_v25 = vrot.slane %v1533_v11, 1 }
 0x13c   : > { %v1107_v32 = vrot.slane %v1025_v29, 6  ;;  %v1105_v44 = vrot.slane %v1025_v29, 2  ;;  %v1106_v45 = vrot.slane %v1025_v29, 4 }
 0x13d   : > { %v2925_v33 = vpack.c.b16 %v1422_v26, %v1421_v30  ;;  %v1538_v26 = vshll.u32 %v2951_v10, 16 }
 0x13f   : > { %v994_v39 = vpop.f32.mrf.mxu0  ;;  %v1545_v48 = vshll.u32 %v2925_v33, 16  ;;  %v1543_v28 = vshrl.u32 %v2925_v33, 16 }
 0x140   : > { %v2930_v43 = vld.sshfl [vmem:[#allocation1 + $0x20] sm:$0xff pattern:$0x73625140]  ;;  %v995_v50 = vadd.f32 %v2839_v27, %v994_v39 }
 0x141   : > { %1272 = vst [vmem:[#allocation1 + $0x20] ss:$4 sm:$0xff] %v1107_v32  ;;  %v1262_v46 = vld.sshfl [vmem:[#allocation1] sm:$0xff pattern:$0x73625140]  ;;  %v1547_v58 = vrot.slane %v1545_v48, 1 }
 0x142   : > { %v1349_v51 = vsel %vm1130_vm6, %v1262_v46, 0.0  ;;  %1268 = vst [vmem:[#allocation1] ss:$4 sm:$0xff] %v1104_v36  ;;  %v1026_v0 = vmax.f32 %v995_v50, 0.0  ;;  %v1531_v32 = vshrl.u32 %v2944_v60, 16  ;;  %v1497_v46 = vshll.u32 %v2954_v22, 16 }
 0x143   : > { %v1379_v52 = vpack.c.bf16 %v1349_v51, %v1349_v51  ;;  %1269 = vst [vmem:[#allocation1 + $0x1] ss:$4 sm:$0xff] %v1025_v29  ;;  %v1548_v8 = vor.u32 %v1547_v58, %v1543_v28  ;;  %v1451_v29 = vunpack.c.l.b16 %v1367_v7  ;;  %v1495_v51 = vshrl.u32 %v2954_v22, 16 }
 0x144   : > { %1270 = vst [vmem:[#allocation1 + $0x2] ss:$4 sm:$0xff] %v1105_v44  ;;  %v1108_v12 = vrot.slane %v1026_v0, 2  ;;  %v1109_v15 = vrot.slane %v1026_v0, 4  ;;  %v1110_v20 = vrot.slane %v1026_v0, 6  ;;  %v1536_v40 = vor.u32 %v1535_v25, %v1531_v32 }
 0x145   : > { %v1455_v57 = vunpack.c.l.b16 %v1379_v52  ;;  %1271 = vst [vmem:[#allocation1 + $0x3] ss:$4 sm:$0xff] %v1106_v45  ;;  %v1540_v44 = vrot.slane %v1538_v26, 1  ;;  %v2963_v45 = vpack.c.b16 %v1451_v29, %v1451_v29  ;;  %v1499_v49 = vrot.slane %v1497_v46, 1 }
 0x147   : > { %v2946_v3 = vpack.c.b16 %v1455_v57, %v1455_v57  ;;  %v996_v4 = vpop.f32.mrf.mxu0  ;;  %v1541_v18 = vsel %vm1469_vm7, %v1536_v40, %v1540_v44  ;;  %v1502_v50 = vshll.u32 %v2963_v45, 16  ;;  %v1500_v58 = vor.u32 %v1499_v49, %v1495_v51 }
 0x148   : > { %v997_v6 = vadd.f32 %v2839_v27, %v996_v4  ;;  %v1274_v39 = vld.sshfl [vmem:[#allocation1 + $0x20] sm:$0xff pattern:$0x73625140]  ;;  %v1350_v4 = vsel %vm1125_vm5, %v2930_v43, 0.0 }
 0x149   : > { %v1550_v21 = vshll.u32 %v2946_v3, 16  ;;  %v1504_v63 = vrot.slane %v1502_v50, 1 }
 0x14a   : > { %v1027_v13 = vmax.f32 %v997_v6, 0.0 }
 0x14b   : > { %v1552_v17 = vrot.slane %v1550_v21, 1  ;;  %v1352_v21 = vsel %vm1130_vm6, %v1274_v39, 0.0  ;;  %v1505_v11 = vsel %vm1469_vm7, %v1500_v58, %v1504_v63 }
 0x14c   : > { %v2956_v23 = vld.sshfl [vmem:[#allocation1] sm:$0xff pattern:$0x73625140]  ;;  %v1111_v30 = vrot.slane %v1027_v13, 2  ;;  %v1112_v31 = vrot.slane %v1027_v13, 4  ;;  %v1113_v36 = vrot.slane %v1027_v13, 6 }
 0x14d   : > { %v1553_v24 = vsel %vm1469_vm7, %v1548_v8, %v1552_v17  ;;  %1275 = vst [vmem:[#allocation1] ss:$4 sm:$0xff] %v1026_v0  ;;  %v1381_v7 = vpack.c.bf16 %v2956_v23, %v2956_v23  ;;  %v1382_v23 = vpack.c.bf16 %v1352_v21, %v1352_v21 }
 0x14e   : > { %1602 = vrot.lane.b32.xlu1 %v1553_v24, %s2570_s12  ;;  %1276 = vst [vmem:[#allocation1 + $0x1] ss:$4 sm:$0xff] %v1108_v12 }
 0x14f   : > { %v999_v34 = vpop.f32.mrf.mxu0  ;;  %1277 = vst [vmem:[#allocation1 + $0x2] ss:$4 sm:$0xff] %v1109_v15  ;;  %v1424_v24 = vunpack.c.l.b16 %v1381_v7  ;;  %v1456_v39 = vunpack.c.l.b16 %v1382_v23 }
 0x150   : > { %v1000_v38 = vadd.f32 %v2839_v27, %v999_v34  ;;  %1278 = vst [vmem:[#allocation1 + $0x3] ss:$4 sm:$0xff] %v1110_v20 }
 0x151   : > { %1279 = vst [vmem:[#allocation1 + $0x20] ss:$4 sm:$0xff] %v1027_v13  ;;  %v1380_v13 = vpack.c.bf16 %v1350_v4, %v1350_v4  ;;  %v1466_v49 = vpack.c.b16 %v1456_v39, %v1456_v39 }
 0x152   : > { %1280 = vst [vmem:[#allocation1 + $0x21] ss:$4 sm:$0xff] %v1111_v30  ;;  %v1028_v48 = vmax.f32 %v1000_v38, 0.0 }
 0x153   : > { %1281 = vst [vmem:[#allocation1 + $0x22] ss:$4 sm:$0xff] %v1112_v31  ;;  %v1423_v31 = vunpack.c.l.b16 %v1380_v13 }
 0x154   : > { %1282 = vst [vmem:[#allocation1 + $0x23] ss:$4 sm:$0xff] %v1113_v36  ;;  %v1114_v53 = vrot.slane %v1028_v48, 2  ;;  %v1115_v57 = vrot.slane %v1028_v48, 4  ;;  %v1116_v0 = vrot.slane %v1028_v48, 6 }
 0x155   : > { %v2988_v38 = vpack.c.b16 %v1424_v24, %v1423_v31  ;;  %v1363_v31 = vpack.c.bf16 %v2865_v16, %v2865_v16 }
 0x156   : > { %1600 = vrot.lane.b32.xlu1 %v1541_v18, %s2570_s12 }
 0x157   : > { %v1001_v52 = vpop.f32.mrf.mxu0  ;;  %v1283_v41 = vld.sshfl [vmem:[#allocation1] sm:$0xff pattern:$0x73625140]  ;;  %v1557_v50 = vshll.u32 %v2988_v38, 16 }
 0x158   : > { %v1002_v55 = vadd.f32 %v2839_v27, %v1001_v52  ;;  %1285 = vst [vmem:[#allocation1] ss:$4 sm:$0xff] %v1028_v48  ;;  %v1353_v56 = vsel %vm1125_vm5, %v1283_v41, 0.0 }
 0x159   : > { %v1383_v28 = vpack.c.bf16 %v1353_v56, %v1353_v56  ;;  %v1562_v56 = vshll.u32 %v1466_v49, 16 }
 0x15a   : > { %v1029_v2 = vmax.f32 %v1002_v55, 0.0  ;;  %v1559_v55 = vrot.slane %v1557_v50, 1 }
 0x15b   : > { %v1284_v6 = vld.sshfl [vmem:[#allocation1 + $0x20] sm:$0xff pattern:$0x73625140]  ;;  %v1425_v15 = vunpack.c.l.b16 %v1383_v28  ;;  %v1564_v63 = vrot.slane %v1562_v56, 1 }
 0x15c   : > { %v1117_v35 = vrot.slane %v1029_v2, 2  ;;  %v1384_v8 = vpack.c.bf16 %v1284_v6, %v1284_v6  ;;  %1287 = vst [vmem:[#allocation1 + $0x20] ss:$4 sm:$0xff] %v1114_v53  ;;  %v1118_v12 = vrot.slane %v1029_v2, 4  ;;  %v1119_v14 = vrot.slane %v1029_v2, 6 }
 0x15d   : > { %1288 = vst [vmem:[#allocation1 + $0x21] ss:$4 sm:$0xff] %v1115_v57  ;;  %v1555_v57 = vshrl.u32 %v2988_v38, 16 }
 0x15e   : > { %1594 = vrot.lane.b32.xlu1 %v1505_v11, %s2570_s12  ;;  %v1426_v43 = vunpack.c.l.b16 %v1384_v8  ;;  %1289 = vst [vmem:[#allocation1 + $0x22] ss:$4 sm:$0xff] %v1116_v0 }
 0x15f   : > { %v1004_v17 = vpop.f32.mrf.mxu0  ;;  %v1286_v20 = vld.sshfl [vmem:[#allocation1] sm:$0xff pattern:$0x73625140]  ;;  %1290 = vst [vmem:[#allocation1 + $0x23] ss:$4 sm:$0xff] %v1029_v2  ;;  %v1560_v58 = vor.u32 %v1559_v55, %v1555_v57  ;;  %v1136_v2 = vstv %s1135_s13 }
 0x160   : > { %v1005_v25 = vadd.f32 %v2839_v27, %v1004_v17  ;;  %v1355_v26 = vsel %vm1130_vm6, %v1286_v20, 0.0  ;;  %v2985_v29 = vpack.c.b16 %v1426_v43, %v1425_v15  ;;  %1292 = vst [vmem:[#allocation1] ss:$4 sm:$0xff] %v1117_v35  ;;  %vm1137_vm8 = vcmp.eq.s32.totalorder %v1136_v2, 1 }
 0x161   : > { %v1385_v30 = vpack.c.bf16 %v1355_v26, %v1355_v26  ;;  %1293 = vst [vmem:[#allocation1 + $0x1] ss:$4 sm:$0xff] %v1118_v12  ;;  %v1565_v0 = vsel %vm1469_vm7, %v1560_v58, %v1564_v63  ;;  %vm1138_vm9 = vmand %vm1125_vm5, %vm1137_vm8  ;;  %v1330_v28 = vsel %vm1137_vm8, %v2850_v54, 0.0  ;;  %v1332_v26 = vsel %vm1125_vm5, %v2856_v62, 0.0 }
 0x162   : > { %v1030_v32 = vmax.f32 %v1005_v25, 0.0  ;;  %v1569_v34 = vshll.u32 %v2985_v29, 16  ;;  %1294 = vst [vmem:[#allocation1 + $0x2] ss:$4 sm:$0xff] %v1119_v14  ;;  %v1567_v48 = vshrl.u32 %v2985_v29, 16  ;;  %vm1140_vm10 = vmand %vm1130_vm6, %vm1137_vm8  ;;  %v1329_v4 = vsel %vm1138_vm9, %v2853_v59, 0.0 }
 0x163   : > { %v1457_v36 = vunpack.c.l.b16 %v1385_v30  ;;  %v1331_v6 = vsel %vm1140_vm10, %v2860_v5, 0.0  ;;  %v1360_v7 = vpack.c.bf16 %v1330_v28, %v1330_v28  ;;  %v1359_v8 = vpack.c.bf16 %v1329_v4, %v1329_v4 }
 0x164   : > { %v1120_v40 = vrot.slane %v1030_v32, 2  ;;  %1295 = vst [vmem:[#allocation1 + $0x3] ss:$4 sm:$0xff] %v1030_v32  ;;  %v1571_v44 = vrot.slane %v1569_v34, 1  ;;  %v1361_v21 = vpack.c.bf16 %v1331_v6, %v1331_v6  ;;  %v1334_v32 = vsel %vm1130_vm6, %v2862_v9, 0.0 }
 0x165   : > { %v2990_v27 = vpack.c.b16 %v1457_v36, %v1457_v36  ;;  %v1410_v11 = vunpack.c.l.b16 %v1360_v7  ;;  %v1409_v14 = vunpack.c.l.b16 %v1359_v8  ;;  %v1362_v36 = vpack.c.bf16 %v1332_v26, %v1332_v26 }
 0x166   : > { %v2992_v46 = vld.sshfl [vmem:[#allocation1 + $0x20] sm:$0xff pattern:$0x73625140]  ;;  %v1572_v52 = vor.u32 %v1571_v44, %v1567_v48  ;;  %v1449_v15 = vunpack.c.l.b16 %v1361_v21  ;;  %v1364_v39 = vpack.c.bf16 %v1334_v32, %v1334_v32  ;;  %v1632_v44 = vrot.slane %v2988_v38, 1 }
 0x167   : > { %v1574_v18 = vshll.u32 %v2990_v27, 16  ;;  %v1006_v51 = vpop.f32.mrf.mxu0  ;;  %1296 = vst [vmem:[#allocation1 + $0x20] ss:$4 sm:$0xff] %v1120_v40  ;;  %v3018_v54 = vpack.c.b16 %v1410_v11, %v1409_v14  ;;  %v1412_v40 = vunpack.c.l.b16 %v1363_v31  ;;  %v1633_v48 = vrot.slane %v1466_v49, 1 }
 0x168   : > { %v3020_v59 = vpack.c.b16 %v1449_v15, %v1449_v15  ;;  %v1450_v50 = vunpack.c.l.b16 %v1364_v39  ;;  %v1629_v15 = vrot.slane %v2925_v33, 1 }
 0x169   : > { %v1576_v41 = vrot.slane %v1574_v18, 1  ;;  %v1473_v43 = vshll.u32 %v3018_v54, 16  ;;  %v1471_v24 = vshrl.u32 %v3018_v54, 16  ;;  %v1411_v18 = vunpack.c.l.b16 %v1362_v36 }
 0x16a   : > { %v1478_v20 = vshll.u32 %v3020_v59, 16  ;;  %v3045_v16 = vsel %vm1610_vm12, %v1632_v44, %v1633_v48  ;;  %v1460_v9 = vpack.c.b16 %v1450_v50, %v1450_v50 }
 0x16b   : > { %v1577_v53 = vsel %vm1469_vm7, %v1572_v52, %v1576_v41  ;;  %v1475_v23 = vrot.slane %v1473_v43, 1  ;;  %v3042_v62 = vpack.c.b16 %v1412_v40, %v1411_v18  ;;  %v1624_v52 = vrot.slane %v2904_v42, 1 }
 0x16c   : > { %1606 = vrot.lane.b32.xlu0 %v1577_v53, %s2570_s12  ;;  %v1480_v25 = vrot.slane %v1478_v20, 1  ;;  %v1623_v53 = vrot.slane %v2894_v19, 1  ;;  %v1490_v56 = vshll.u32 %v1460_v9, 16 }
 0x16d   : > { %v1476_v30 = vor.u32 %v1475_v23, %v1471_v24  ;;  %v1485_v51 = vshll.u32 %v3042_v62, 16  ;;  %v1483_v58 = vshrl.u32 %v3042_v62, 16  ;;  %v1614_v28 = vrot.slane %v3042_v62, 1  ;;  %v1297_v24 = vld.sshfl [vmem:[#allocation1] sm:$0xff pattern:$0x73625140] }
 0x16e   : > { %v3059_v57 = vsel %vm1610_vm12, %v1623_v53, %v1624_v52  ;;  %v1492_v63 = vrot.slane %v1490_v56, 1  ;;  %v1146_v23 = vstv %s1145_s14 }
 0x16f   : > { %v1481_v34 = vsel %vm1469_vm7, %v1476_v30, %v1480_v25  ;;  %v1487_v55 = vrot.slane %v1485_v51, 1  ;;  %vm1147_vm13 = vcmp.eq.s32.totalorder %v1146_v23, 1  ;;  %v1298_v25 = vld.sshfl [vmem:[#allocation1 + $0x20] sm:$0xff pattern:$0x73625140] }
 0x170   : > { %vm1151_vm14 = vmand %vm1125_vm5, %vm1147_vm13 }
 0x171   : > { %v1488_v42 = vor.u32 %v1487_v55, %v1483_v58  ;;  %vm1153_vm15 = vmand %vm1130_vm6, %vm1147_vm13  ;;  %v1356_v26 = vsel %vm1151_vm14, %v2992_v46, 0.0 }
 0x172   : > { %v1358_v32 = vsel %vm1153_vm15, %v1298_v25, 0.0  ;;  %v2293_v25 = vld [vmem:[%s3454_s4 + $0x28] sm:$0xf] }
 0x173   : > { %v1493_v4 = vsel %vm1469_vm7, %v1488_v42, %v1492_v63  ;;  %v1388_v36 = vpack.c.bf16 %v1358_v32, %v1358_v32  ;;  %v1627_v42 = vrot.slane %v2951_v10, 1  ;;  %v2571_v32 = vmov 0  }
 0x174   : > { %1604 = vrot.lane.b32.xlu0 %v1565_v0, %s2570_s12  ;;  %v1615_v0 = vrot.slane %v1460_v9, 1  ;;  %2472 = vset.pattern.permute.xlu1 %v2571_v32 }
 0x175   : > { %v1458_v18 = vunpack.c.l.b16 %v1388_v36  ;;  %2471 = vset.pattern.permute.xlu0 %v2571_v32  ;;  %2470 = vset.pattern.permute.xlu2 %v2571_v32  ;;  %v1612_v36 = vrot.slane %v3020_v59, 1  ;;  %v2369_v59 = vld [vmem:[%s3454_s4 + $0x4] sm:$0xf] }
 0x176   : > { %v3074_v7 = vsel %vm1610_vm12, %v1614_v28, %v1615_v0 }
 0x177   : > { %v3140_v46 = vpack.c.b16 %v1458_v18, %v1458_v18 }
 0x179   : > { %v1586_v58 = vshll.u32 %v3140_v46, 16 }
 0x186   : > { %v3010_v35 = vpop.permute.xlu2 %1598 }
 0x187   : > { %v3082_v21 = vsel %vm1641_vm11, %v2894_v19, %v3010_v35  ;;  %v1636_v19 = vrot.slane %v2990_v27, 1  ;;  %v1635_v35 = vrot.slane %v2985_v29, 1  ;;  %v1621_v27 = vrot.slane %v2908_v47, 1 }
 0x189   : > { %v3103_v14 = vsel %vm1610_vm12, %v1635_v35, %v1636_v19 }
 0x18e   : > { %v1597_v5 = vpop.permute.xlu2 %1596 }
 0x18f   : > { %v3025_v17 = vsel %vm1641_vm11, %v2900_v37, %v1597_v5  ;;  %v1630_v5 = vrot.slane %v2946_v3, 1 }
 0x191   : > { %v3111_v43 = vsel %vm1610_vm12, %v1629_v15, %v1630_v5 }
 0x1c0   : > { %v1603_v12 = vpop.permute.xlu1 %1602 }
 0x1c1   : > { %v3014_v13 = vsel %vm1641_vm11, %v2925_v33, %v1603_v12 }
 0x1c2   : > { %1700 = vrot.lane.b32.xlu1 %v3014_v13, %s2570_s12 }
 0x1c8   : > { %v1601_v8 = vpop.permute.xlu1 %1600 }
 0x1ca   : > { %1688 = vrot.lane.b32.xlu1 %v3025_v17, %s2570_s12 }
 0x1d0   : > { %v1595_v11 = vpop.permute.xlu1 %1594 }
 0x1d1   : > { %v3095_v12 = vsel %vm1641_vm11, %v2954_v22, %v1595_v11 }
 0x1d2   : > { %1590 = vrot.lane.b32.xlu1 %v1481_v34, %s2570_s12  ;;  %v1386_v34 = vpack.c.bf16 %v1356_v26, %v1356_v26  ;;  %v2376_v26 = vld [vmem:[%s3454_s4 + $0x38] sm:$0xf0] }
 0x1d4   : > { %v1427_v44 = vunpack.c.l.b16 %v1386_v34  ;;  %v1639_v34 = vrot.slane %v3140_v46, 1  ;;  %v2313_v46 = vld [vmem:[%s3454_s4 + $0x50] sm:$0xf] }
 0x1da   : > { %1706 = vrot.lane.b32.xlu1 %v3045_v16, %s2570_s12 }
 0x1de   : > { %v1607_v41 = vpop.permute.xlu0 %1606 }
 0x1df   : > { %v3054_v49 = vsel %vm1641_vm11, %v2985_v29, %v1607_v41  ;;  %v1620_v29 = vrot.slane %v2900_v37, 1  ;;  %v1357_v37 = vsel %vm1147_vm13, %v1297_v24, 0.0  ;;  %v2371_v24 = vld [vmem:[%s3454_s4 + $0x10] sm:$0xf0] }
 0x1e0   : > { %1708 = vrot.lane.b32.xlu0 %v3054_v49, %s2570_s12  ;;  %v1387_v31 = vpack.c.bf16 %v1357_v37, %v1357_v37 }
 0x1e1   : > { %v3119_v20 = vsel %vm1610_vm12, %v1620_v29, %v1621_v27  ;;  %v1617_v29 = vrot.slane %v2954_v22, 1  ;;  %v1618_v27 = vrot.slane %v2963_v45, 1  ;;  %v2273_v45 = vld [vmem:[%s3454_s4] sm:$0xf] }
 0x1e2   : > { %1694 = vrot.lane.b32.xlu1 %v3059_v57, %s2570_s12  ;;  %v1428_v39 = vunpack.c.l.b16 %v1387_v31  ;;  %v2274_v37 = vor.u32 %v2371_v24, %v2273_v45  ;;  %v2294_v31 = vor.u32 %v2376_v26, %v2293_v25  ;;  %v1947_v45 = vsel %vm1641_vm11, %v3119_v20, 0  ;;  %v2372_v24 = vld [vmem:[%s3454_s4 + $0x18] sm:$0xf0]  ;;  %v2301_v25 = vld [vmem:[%s3454_s4 + $0x30] sm:$0xf] }
 0x1e3   : > { %v3177_v23 = vsel %vm1610_vm12, %v1617_v29, %v1618_v27  ;;  %v1949_v27 = vsel %vm1641_vm11, %v3059_v57, 0  ;;  %v2377_v26 = vld [vmem:[%s3454_s4 + $0x40] sm:$0xf0] }
 0x1e4   : > { %v3138_v1 = vpack.c.b16 %v1428_v39, %v1427_v44 }
 0x1e6   : > { %v1605_v2 = vpop.permute.xlu0 %1604  ;;  %v1581_v9 = vshll.u32 %v3138_v1, 16  ;;  %v1579_v63 = vshrl.u32 %v3138_v1, 16  ;;  %v1638_v39 = vrot.slane %v3138_v1, 1 }
 0x1e7   : > { %v3068_v6 = vsel %vm1641_vm11, %v2988_v38, %v1605_v2  ;;  %v3086_v38 = vsel %vm1641_vm11, %v2944_v60, %v1601_v8  ;;  %v1626_v2 = vrot.slane %v2944_v60, 1 }
 0x1e8   : > { %1592 = vrot.lane.b32.xlu0 %v1493_v4, %s2570_s12  ;;  %1704 = vrot.lane.b32.xlu2 %v3068_v6, %s2570_s12  ;;  %v1583_v56 = vrot.slane %v1581_v9, 1  ;;  %v1588_v4 = vrot.slane %v1586_v58, 1  ;;  %v1640_v44 = vsel %vm1610_vm12, %v1638_v39, %v1639_v34  ;;  %v1958_v58 = vsel %vm1641_vm11, %v3103_v14, 0  ;;  %v2382_v39 = vld [vmem:[%s3454_s4 + $0x68] sm:$0xf0] }
 0x1e9   : > { %1963 = vmatpush.bf16.xpose.msra.mxu1 %v3068_v6  ;;  %v3154_v8 = vsel %vm1610_vm12, %v1626_v2, %v1627_v42  ;;  %v1961_v9 = vsel %vm1641_vm11, %v1640_v44, 0  ;;  %v1785_v42 = vld [vmem:[%s3455_s5] sm:$0xff]  ;;  %v2303_v44 = vld [vmem:[%s3454_s4 + $0x44] sm:$0xf0] }
 0x1ea   : > { %1682 = vrot.lane.b32.xlu1 %v3074_v7, %s2570_s12  ;;  %v1584_v28 = vor.u32 %v1583_v56, %v1579_v63  ;;  %v2295_v2 = vld [vmem:[%s3454_s4 + $0x3c] sm:$0xf0] }
 0x1ec   : > { %v1589_v10 = vsel %vm1469_vm7, %v1584_v28, %v1588_v4  ;;  %v2333_v28 = vld [vmem:[%s3454_s4 + $0x78] sm:$0xf] }
 0x1f0   : > { %1692 = vrot.lane.b32.xlu0 %v3082_v21, %s2570_s12  ;;  %1696 = vrot.lane.b32.xlu2 %v3086_v38, %s2570_s12 }
 0x1f1   : > { %1964 = vmatpush.bf16.xpose.msra.mxu1 %v3014_v13 }
 0x1f8   : > { %1684 = vrot.lane.b32.xlu2 %v3095_v12, %s2570_s12 }
 0x1f9   : > { %1965 = vmatpush.bf16.xpose.msra.mxu1 %v3086_v38 }
 0x200   : > { %1710 = vrot.lane.b32.xlu2 %v3103_v14, %s2570_s12  ;;  %v2374_v14 = vld [vmem:[%s3454_s4 + $0x2c] sm:$0xf] }
 0x201   : > { %1966 = vmatpush.bf16.xpose.msra.mxu1 %v3082_v21  ;;  %v2298_v4 = vor.u32 %v2374_v14, %v2295_v2 }
 0x208   : > { %1702 = vrot.lane.b32.xlu2 %v3111_v43, %s2570_s12 }
 0x209   : > { %1967 = vmatpush.bf16.xpose.msra.mxu1 %v3025_v17 }
 0x210   : > { %1690 = vrot.lane.b32.xlu2 %v3119_v20, %s2570_s12 }
 0x211   : > { %1968 = vmatpush.bf16.xpose.msra.mxu1 %v3095_v12 }
 0x218   : > { %1795 = vperm.xlu2 %2470, %v1785_v42   ;;  %v2385_v42 = vld [vmem:[%s3454_s4 + $0x84] sm:$0xf] }
 0x234   : > { %v1701_v33 = vpop.permute.xlu1 %1700 }
 0x23c   : > { %v3132_v30 = vpop.permute.xlu1 %1688 }
 0x242   : > { %v1705_v3 = vpop.permute.xlu2 %1704 }
 0x243   : > { %v1755_v41 = vsel %vm1641_vm11, %v3111_v43, %v1705_v3 }
 0x244   : > { %v1591_v50 = vpop.permute.xlu1 %1590 }
 0x245   : > { %v1643_v19 = vsel %vm1641_vm11, %v3018_v54, %v1591_v50 }
 0x24a   : > { %v3127_v47 = vpop.permute.xlu2 %1696 }
 0x24b   : > { %v1747_v35 = vsel %vm1641_vm11, %v3059_v57, %v3127_v47  ;;  %v2335_v57 = vld [vmem:[%s3454_s4 + $0x8c] sm:$0xf0] }
 0x24c   : > { %v1707_v0 = vpop.permute.xlu1 %1706 }
 0x24d   : > { %v1719_v11 = vsel %vm1641_vm11, %v1705_v3, %v1707_v0 }
 0x252   : > { %v3134_v40 = vpop.permute.xlu2 %1684  ;;  %v1709_v61 = vpop.permute.xlu0 %1708 }
 0x253   : > { %v1759_v48 = vsel %vm1641_vm11, %v3045_v16, %v1709_v61  ;;  %v1735_v22 = vsel %vm1641_vm11, %v3074_v7, %v3134_v40  ;;  %v1786_v7 = vld [vmem:[%s3455_s5 + $0x8] sm:$0xff] }
 0x254   : > { %1992 = vmatpush.bf16.xpose.msra.mxu2 %v1759_v48 }
 0x25a   : > { %v1711_v51 = vpop.permute.xlu2 %1710  ;;  %v1593_v52 = vpop.permute.xlu0 %1592 }
 0x25b   : > { %v1720_v53 = vsel %vm1641_vm11, %v1709_v61, %v1711_v51  ;;  %v1646_v55 = vsel %vm1641_vm11, %v3042_v62, %v1593_v52  ;;  %v1751_v62 = vsel %vm1641_vm11, %v3154_v8, %v1701_v33  ;;  %v1611_v61 = vrot.slane %v3018_v54, 1  ;;  %v2275_v54 = vld [vmem:[%s3454_s4 + $0x14] sm:$0xf0]  ;;  %v2381_v51 = vld [vmem:[%s3454_s4 + $0x60] sm:$0xf0]  ;;  %v1787_v52 = vld [vmem:[%s3455_s5 + $0x10] sm:$0xff] }
 0x25c   : > { %1993 = vmatpush.bf16.xpose.msra.mxu2 %v1755_v41  ;;  %2021 = vmatpush.bf16.xpose.msra.mxu3 %v1720_v53  ;;  %v2314_v41 = vor.u32 %v2381_v51, %v2313_v46  ;;  %v2278_v53 = vor.u32 %v2369_v59, %v2275_v54  ;;  %v2341_v54 = vld [vmem:[%s3454_s4 + $0x80] sm:$0xf]  ;;  %v2387_v46 = vld [vmem:[%s3454_s4 + $0x90] sm:$0xf0]  ;;  %v2380_v51 = vld [vmem:[%s3454_s4 + $0x5c] sm:$0xf] }
 0x25d   : > { %1680 = vrot.lane.b32.xlu0 %v1646_v55, %s2570_s12  ;;  %1969 = vmatpush.bf16.xpose.msra.mxu1 %v1646_v55  ;;  %v1613_v18 = vsel %vm1610_vm12, %v1611_v61, %v1612_v36  ;;  %v2321_v36 = vld [vmem:[%s3454_s4 + $0x58] sm:$0xf]  ;;  %v2375_v61 = vld [vmem:[%s3454_s4 + $0x34] sm:$0xf] }
 0x25e   : > { %1805 = vperm.xlu1 %2472, %v1787_v52   ;;  %v2323_v52 = vld [vmem:[%s3454_s4 + $0x6c] sm:$0xf0] }
 0x262   : > { %v1703_v60 = vpop.permute.xlu2 %1702  ;;  %v3169_v5 = vpop.permute.xlu0 %1692 }
 0x263   : > { %v1718_v15 = vsel %vm1641_vm11, %v1701_v33, %v1703_v60  ;;  %v1743_v3 = vsel %vm1641_vm11, %v3119_v20, %v3169_v5  ;;  %v1739_v33 = vsel %vm1641_vm11, %v3177_v23, %v3132_v30 }
 0x264   : > { %1994 = vmatpush.bf16.xpose.msra.mxu2 %v1751_v62  ;;  %2022 = vmatpush.bf16.xpose.msra.mxu3 %v1719_v11  ;;  %v1695_v62 = vpop.permute.xlu1 %1694 }
 0x265   : > { %1970 = vmatpush.bf16.xpose.msra.mxu1 %v1643_v19  ;;  %1608 = vrot.lane.b32.xlu0 %v1589_v10, %s2570_s12  ;;  %v1716_v11 = vsel %vm1641_vm11, %v3169_v5, %v1695_v62  ;;  %v1953_v19 = vsel %vm1641_vm11, %v3111_v43, 0  ;;  %v1788_v10 = vld [vmem:[%s3455_s5 + $0x18] sm:$0xff]  ;;  %v2315_v43 = vld [vmem:[%s3454_s4 + $0x64] sm:$0xf0] }
 0x266   : > { %1810 = vperm.xlu2 %2470, %v1788_v10   ;;  %v1792_v5 = vld [vmem:[%s3455_s5 + $0x38] sm:$0xff] }
 0x26a   : > { %v1691_v60 = vpop.permute.xlu2 %1690 }
 0x26c   : > { %1995 = vmatpush.bf16.xpose.msra.mxu2 %v1747_v35  ;;  %2023 = vmatpush.bf16.xpose.msra.mxu3 %v1718_v15  ;;  %v1715_v35 = vsel %vm1641_vm11, %v3132_v30, %v1691_v60  ;;  %v2379_v15 = vld [vmem:[%s3454_s4 + $0x54] sm:$0xf] }
 0x26d   : > { %1698 = vrot.lane.b32.xlu0 %v3154_v8, %s2570_s12  ;;  %1971 = vmatmul.bf16.vlgmr.msra.gmra.mxu1 %v2274_v37  ;;  %v1791_v30 = vld [vmem:[%s3455_s5 + $0x30] sm:$0xff]  ;;  %v2318_v29 = vor.u32 %v2379_v15, %v2315_v43 }
 0x274   : > { %1996 = vmatpush.bf16.xpose.msra.mxu2 %v1743_v3  ;;  %v1790_v3 = vld [vmem:[%s3455_s5 + $0x28] sm:$0xff] }
 0x275   : > { %1686 = vrot.lane.b32.xlu0 %v3177_v23, %s2570_s12  ;;  %1820 = vperm.xlu2 %2470, %v1790_v3   ;;  %s2357_s12 = sshll.u32 %s2127_s9, 3 }
 0x276   : > { %s2129_s14 = scalar_lea.hbm %s3456_s6, %s2357_s12 }
 0x277   : > { %s2132_s24 = sshll.u32 %s2129_s14, 4  ;;  %s2133_s24 = int_to_ptr.hbm [resolvable:$true] %s2132_s24 }
 0x278   : > { %s2488_s8 = sshra.s32 %s2133_s24, 4  ;;  %s2489_s8 = int_to_ptr.hbm [resolvable:$true] %s2488_s8 }
 0x279   : > { %s2490_s18 = scalar_lea.hbm %s2489_s8, 64  ;;  %p2495_p7 = scmp.lt.s32.totalorder %s2489_s8, %s3456_s6 }
 0x27a   : > { %p2491_p4 = scmp.ne.s32.totalorder %s2489_s8, %s2490_s18  ;;  %p2496_p9 = scmp.lt.s32.totalorder %s2494_s7, %s2490_s18 }
 0x27c   : > { %1997 = vmatpush.bf16.xpose.msra.mxu2 %v1739_v33  ;;  %v1683_v33 = vpop.permute.xlu1 %1682  ;;  %p2492_p5 = pnand %p2491_p4, %p2661_p3  ;;  %p2497_p10 = por %p2496_p9, %p2495_p7 }
 0x27d   : > { %1800 = vperm.xlu0 %2471, %v1786_v7   ;;  %1976 = vmatmul.bf16.gmra.mxu1 %v2294_v31  ;;  %v2370_v7 = vld [vmem:[%s3454_s4 + $0xc] sm:$0xf]  ;;  %v2302_v31 = vor.u32 %v2377_v26, %v2301_v25 }
 0x27e   : > { %p2493_p6 = pneg %p2492_p5 }
 0x280   : > { %p2498_p11 = pnand %p2497_p10, %p2493_p6 }
 0x284   : > { %1998 = vmatpush.bf16.xpose.msra.mxu2 %v1735_v22 }
 0x285   : > { %1825 = vperm.xlu0 %2471, %v1791_v30  }
 0x28d   : > { %1981 = vmatmul.bf16.gmra.mxu1 %v2314_v41  ;;  %v2329_v41 = vld [vmem:[%s3454_s4 + $0x60] sm:$0xf] }
 0x2cf   : > { %v3207_v48 = vpop.permute.xlu0 %1680 }
 0x2d0   : > { %v1731_v50 = vsel %vm1641_vm11, %v1613_v18, %v3207_v48  ;;  %v1713_v22 = vsel %vm1641_vm11, %v3207_v48, %v1683_v33  ;;  %v2309_v48 = vld [vmem:[%s3454_s4 + $0x38] sm:$0xf]  ;;  %v2378_v18 = vld [vmem:[%s3454_s4 + $0x48] sm:$0xf0]  ;;  %v1806_v25 = vpop.permute.xlu1 %1805 }
 0x2d1   : > { %1999 = vmatpush.bf16.xpose.msra.mxu2 %v1731_v50  ;;  %v2322_v50 = vor.u32 %v2382_v39, %v2321_v36  ;;  %v2310_v59 = vor.u32 %v2378_v18, %v2309_v48 }
 0x2d7   : > { %v1609_v55 = vpop.permute.xlu0 %1608 }
 0x2d8   : > { %2000 = vmatmul.bf16.vlgmr.msra.gmra.mxu2 %v2278_v53  ;;  %v1670_v56 = vsel %vm1641_vm11, %v3138_v1, %v1609_v55  ;;  %v1955_v1 = vsel %vm1641_vm11, %v3045_v16, 0  ;;  %v1789_v16 = vld [vmem:[%s3455_s5 + $0x20] sm:$0xff]  ;;  %v2383_v53 = vld [vmem:[%s3454_s4 + $0x70] sm:$0xf0]  ;;  %v2342_v55 = vor.u32 %v2387_v46, %v2341_v54 }
 0x2d9   : > { %2079 = vmatpush.bf16.xpose.msrb.mxu2 %v1961_v9  ;;  %2050 = vmatpush.bf16.xpose.msrb.mxu1 %v1670_v56  ;;  %v2306_v9 = vor.u32 %v2375_v61, %v2303_v44  ;;  %v2326_v56 = vor.u32 %v2380_v51, %v2323_v52 }
 0x2da   : > { %1815 = vperm.xlu1 %2472, %v1789_v16  }
 0x2df   : > { %v1699_v63 = vpop.permute.xlu0 %1698 }
 0x2e0   : > { %v1717_v0 = vsel %vm1641_vm11, %v3127_v47, %v1699_v63  ;;  %v2343_v63 = vld [vmem:[%s3454_s4 + $0x94] sm:$0xf0] }
 0x2e1   : > { %2080 = vmatpush.bf16.xpose.msrb.mxu2 %v1958_v58  ;;  %2024 = vmatpush.bf16.xpose.msra.mxu3 %v1717_v0  ;;  %v2330_v58 = vor.u32 %v2383_v53, %v2329_v41  ;;  %v2349_v0 = vld [vmem:[%s3454_s4 + $0x88] sm:$0xf]  ;;  %v2346_v14 = vor.u32 %v2385_v42, %v2343_v63 }
 0x2e2   : > { %2051 = vmatpush.bf16.xpose.msrb.mxu1 %v3054_v49  ;;  %v2386_v49 = vld [vmem:[%s3454_s4 + $0x88] sm:$0xf0]  ;;  %1830 = vperm.xlu1 %2472, %v1792_v5  }
 0x2e3   : > { %v2334_v47 = vor.u32 %v2386_v49, %v2333_v28 }
 0x2e5   : > { %1986 = vmatmul.bf16.gmra.mxu1 %v2334_v47 }
 0x2e8   : > { %2005 = vmatmul.bf16.gmra.mxu2 %v2298_v4 }
 0x2e9   : > { %2081 = vmatpush.bf16.xpose.msrb.mxu2 %v1955_v1  ;;  %2025 = vmatpush.bf16.xpose.msra.mxu3 %v1716_v11  ;;  %v2388_v1 = vld [vmem:[%s3454_s4 + $0x98] sm:$0xf0] }
 0x2ea   : > { %2052 = vmatpush.bf16.xpose.msrb.mxu1 %v3068_v6  ;;  %v1951_v6 = vsel %vm1641_vm11, %v3154_v8, 0  ;;  %v2350_v2 = vor.u32 %v2388_v1, %v2349_v0  ;;  %v1972_v28 = vpop.f32.mrf.mxu1 }
 0x2f1   : > { %2082 = vmatpush.bf16.xpose.msrb.mxu2 %v1953_v19  ;;  %2026 = vmatpush.bf16.xpose.msra.mxu3 %v1715_v35 }
 0x2f2   : > { %2053 = vmatpush.bf16.xpose.msrb.mxu1 %v3014_v13  ;;  %v1687_v13 = vpop.permute.xlu0 %1686  ;;  %v1974_v49 = vpop.f32.mrf.mxu1 }
 0x2f3   : > { %v1714_v8 = vsel %vm1641_vm11, %v3134_v40, %v1687_v13  ;;  %v2281_v40 = vld [vmem:[%s3454_s4 + $0x8] sm:$0xf] }
 0x2f4   : > { %v2282_v37 = vor.u32 %v2372_v24, %v2281_v40 }
 0x2f8   : > { %2010 = vmatmul.bf16.gmra.mxu2 %v2318_v29  ;;  %v1796_v29 = vpop.permute.xlu2 %1795 }
 0x2f9   : > { %2083 = vmatpush.bf16.xpose.msrb.mxu2 %v1951_v6  ;;  %2027 = vmatpush.bf16.xpose.msra.mxu3 %v1714_v8  ;;  %v1973_v13 = vadd.f32 %v1972_v28, %v1796_v29 }
 0x2fa   : > { %2054 = vmatpush.bf16.xpose.msrb.mxu1 %v3086_v38  ;;  %v2384_v38 = vld [vmem:[%s3454_s4 + $0x7c] sm:$0xf]  ;;  %v1977_v47 = vpop.f32.mrf.mxu1 }
 0x2fb   : > { %v2338_v20 = vor.u32 %v2384_v38, %v2335_v57 }
 0x300   : > { %v1811_v39 = vpop.permute.xlu2 %1810 }
 0x301   : > { %2084 = vmatpush.bf16.xpose.msrb.mxu2 %v1949_v27  ;;  %2028 = vmatpush.bf16.xpose.msra.mxu3 %v1713_v22 }
 0x302   : > { %2055 = vmatpush.bf16.xpose.msrb.mxu1 %v3082_v21  ;;  %v1945_v21 = vsel %vm1641_vm11, %v3177_v23, 0  ;;  %v2289_v23 = vld [vmem:[%s3454_s4 + $0x10] sm:$0xf]  ;;  %v1979_v62 = vpop.f32.mrf.mxu1 }
 0x303   : > { %v1980_v48 = vadd.f32 %v1979_v62, %v1811_v39 }
 0x308   : > { %2015 = vmatmul.bf16.gmra.mxu2 %v2338_v20  ;;  %2029 = vmatmul.bf16.vlgmr.msra.gmra.mxu3 %v2282_v37  ;;  %v1821_v42 = vpop.permute.xlu2 %1820 }
 0x309   : > { %2085 = vmatpush.bf16.xpose.msrb.mxu2 %v1947_v45  ;;  %v1801_v45 = vpop.permute.xlu0 %1800 }
 0x30a   : > { %2056 = vmatpush.bf16.xpose.msrb.mxu1 %v3025_v17  ;;  %v2283_v17 = vld [vmem:[%s3454_s4 + $0x1c] sm:$0xf0]  ;;  %v1982_v19 = vpop.f32.mrf.mxu1  ;;  %v1975_v24 = vadd.f32 %v1974_v49, %v1801_v45 }
 0x30b   : > { %v2286_v32 = vor.u32 %v2370_v7, %v2283_v17  ;;  %v1978_v7 = vadd.f32 %v1977_v47, %v1806_v25 }
 0x311   : > { %2086 = vmatpush.bf16.xpose.msrb.mxu2 %v1945_v21 }
 0x312   : > { %2057 = vmatpush.bf16.xpose.msrb.mxu1 %v3095_v12  ;;  %v2373_v12 = vld [vmem:[%s3454_s4 + $0x20] sm:$0xf0]  ;;  %v1984_v60 = vpop.f32.mrf.mxu1 }
 0x313   : > { %v2290_v34 = vor.u32 %v2373_v12, %v2289_v23 }
 0x318   : > { %2034 = vmatmul.bf16.gmra.mxu3 %v2302_v31  ;;  %2351 = vmatmul.msk.bf16.vlgmr.msrb.gmra.mxu2 %vm1641_vm11, %v2290_v34 }
 0x319   : > { %2058 = vmatmul.bf16.vlgmr.msrb.gmra.mxu1 %v2286_v32 }
 0x328   : > { %2039 = vmatmul.bf16.gmra.mxu3 %v2322_v50  ;;  %2352 = vmatmul.msk.bf16.gmra.mxu2 %vm1641_vm11, %v2310_v59 }
 0x329   : > { %2063 = vmatmul.bf16.gmra.mxu1 %v2306_v9 }
 0x338   : > { %2044 = vmatmul.bf16.gmra.mxu3 %v2342_v55  ;;  %2353 = vmatmul.msk.bf16.gmra.mxu2 %vm1641_vm11, %v2330_v58 }
 0x339   : > { %2068 = vmatmul.bf16.gmra.mxu1 %v2326_v56 }
 0x348   : > { %2354 = vmatmul.msk.bf16.gmra.mxu2 %vm1641_vm11, %v2350_v2 }
 0x349   : > { %2073 = vmatmul.bf16.gmra.mxu1 %v2346_v14  ;;  %v1985_v14 = vadd.f32 %v1984_v60, %v1821_v42 }
 0x34c   : > { %v1816_v59 = vpop.permute.xlu1 %1815 }
 0x34d   : > { %v1983_v51 = vadd.f32 %v1982_v19, %v1816_v59 }
 0x354   : > { %v1831_v29 = vpop.permute.xlu1 %1830 }
 0x35b   : > { %v2001_v16 = vpop.f32.mrf.mxu2 }
 0x35c   : > { %v2002_v33 = vadd.f32 %v2001_v16, %v1973_v13  ;;  %v1826_v16 = vpop.permute.xlu0 %1825 }
 0x362   : > { %v3379_v15 = vpop.f32.mrf.mxu1 }
 0x363   : > { %v2003_v4 = vpop.f32.mrf.mxu2 }
 0x364   : > { %v2004_v21 = vadd.f32 %v2003_v4, %v1975_v24  ;;  %v1988_v4 = vadd.f32 %v3379_v15, %v1826_v16 }
 0x36a   : > { %v3383_v30 = vpop.f32.mrf.mxu1 }
 0x36b   : > { %v2006_v11 = vpop.f32.mrf.mxu2  ;;  %v1990_v15 = vadd.f32 %v3383_v30, %v1831_v29 }
 0x36c   : > { %v2007_v34 = vadd.f32 %v2006_v11, %v1978_v7 }
 0x373   : > { %v2008_v10 = vpop.f32.mrf.mxu2 }
 0x374   : > { %v2009_v9 = vadd.f32 %v2008_v10, %v1980_v48 }
 0x37b   : > { %v2011_v35 = vpop.f32.mrf.mxu2 }
 0x37c   : > { %v2012_v56 = vadd.f32 %v2011_v35, %v1983_v51 }
 0x383   : > { %v2013_v6 = vpop.f32.mrf.mxu2 }
 0x384   : > { %v2014_v49 = vadd.f32 %v2013_v6, %v1985_v14 }
 0x38b   : > { %v3381_v43 = vpop.f32.mrf.mxu2  ;;  %v2030_v5 = vpop.f32.mrf.mxu3 }
 0x38c   : > { %v2031_v22 = vadd.f32 %v2030_v5, %v2002_v33  ;;  %v2017_v5 = vadd.f32 %v3381_v43, %v1988_v4 }
 0x393   : > { %v3385_v8 = vpop.f32.mrf.mxu2  ;;  %v2032_v27 = vpop.f32.mrf.mxu3 }
 0x394   : > { %v2033_v26 = vadd.f32 %v2032_v27, %v2004_v21  ;;  %v2019_v33 = vadd.f32 %v3385_v8, %v1990_v15 }
 0x396   : > { %v2059_v3 = vpop.f32.mrf.mxu1 }
 0x397   : > { %v2060_v38 = vadd.f32 %v2059_v3, %v2031_v22 }
 0x39b   : > { %v2035_v57 = vpop.f32.mrf.mxu3  ;;  %v2088_v40 = vpop.f32.mrf.mxu2 }
 0x39c   : > { %v2089_v20 = vadd.f32 %v2088_v40, %v2060_v38  ;;  %v2036_v36 = vadd.f32 %v2035_v57, %v2007_v34 }
 0x39e   : > { %v2061_v37 = vpop.f32.mrf.mxu1  ;;  %2108 = vst [vmem:[%s3390_s30] sm:$0xff] %v2089_v20 }
 0x39f   : > { %v2062_v17 = vadd.f32 %v2061_v37, %v2033_v26 }
 0x3a3   : > { %v2090_v23 = vpop.f32.mrf.mxu2  ;;  %v2037_v32 = vpop.f32.mrf.mxu3 }
 0x3a4   : > { %v2091_v12 = vadd.f32 %v2090_v23, %v2062_v17  ;;  %v2038_v46 = vadd.f32 %v2037_v32, %v2009_v9 }
 0x3a6   : > { %v2064_v31 = vpop.f32.mrf.mxu1  ;;  %2109 = vst [vmem:[%s3390_s30 + $0x8] sm:$0xff] %v2091_v12 }
 0x3a7   : > { %v2065_v61 = vadd.f32 %v2064_v31, %v2036_v36 }
 0x3ab   : > { %v2093_v44 = vpop.f32.mrf.mxu2  ;;  %v2040_v54 = vpop.f32.mrf.mxu3 }
 0x3ac   : > { %v2094_v18 = vadd.f32 %v2093_v44, %v2065_v61  ;;  %v2041_v58 = vadd.f32 %v2040_v54, %v2012_v56 }
 0x3ae   : > { %v2066_v50 = vpop.f32.mrf.mxu1  ;;  %2110 = vst [vmem:[%s3390_s30 + $0x10] sm:$0xff] %v2094_v18 }
 0x3af   : > { %v2067_v52 = vadd.f32 %v2066_v50, %v2038_v46 }
 0x3b3   : > { %v2095_v41 = vpop.f32.mrf.mxu2  ;;  %v2042_v63 = vpop.f32.mrf.mxu3 }
 0x3b4   : > { %v2096_v53 = vadd.f32 %v2095_v41, %v2067_v52  ;;  %v2043_v47 = vadd.f32 %v2042_v63, %v2014_v49 }
 0x3b6   : > { %v2069_v55 = vpop.f32.mrf.mxu1  ;;  %2111 = vst [vmem:[%s3390_s30 + $0x18] sm:$0xff] %v2096_v53 }
 0x3b7   : > { %v2070_v0 = vadd.f32 %v2069_v55, %v2041_v58 }
 0x3bb   : > { %v2098_v1 = vpop.f32.mrf.mxu2  ;;  %v2045_v11 = vpop.f32.mrf.mxu3 }
 0x3bc   : > { %v2099_v2 = vadd.f32 %v2098_v1, %v2070_v0  ;;  %v2046_v60 = vadd.f32 %v2045_v11, %v2017_v5 }
 0x3be   : > { %v2071_v28 = vpop.f32.mrf.mxu1  ;;  %2112 = vst [vmem:[%s3390_s30 + $0x20] sm:$0xff] %v2099_v2 }
 0x3bf   : > { %v2072_v62 = vadd.f32 %v2071_v28, %v2043_v47 }
 0x3c3   : > { %v2100_v19 = vpop.f32.mrf.mxu2  ;;  %v2047_v3 = vpop.f32.mrf.mxu3 }
 0x3c4   : > { %v2101_v10 = vadd.f32 %v2100_v19, %v2072_v62  ;;  %v2048_v22 = vadd.f32 %v2047_v3, %v2019_v33 }
 0x3c6   : > { %v2074_v35 = vpop.f32.mrf.mxu1  ;;  %2113 = vst [vmem:[%s3390_s30 + $0x28] sm:$0xff] %v2101_v10 }
 0x3c7   : > { %v2075_v6 = vadd.f32 %v2074_v35, %v2046_v60 }
 0x3cb   : > { %v2103_v13 = vpop.f32.mrf.mxu2 }
 0x3cc   : > { %v2104_v27 = vadd.f32 %v2103_v13, %v2075_v6 }
 0x3ce   : > { %2114 = vst [vmem:[%s3390_s30 + $0x30] sm:$0xff] %v2104_v27  ;;  %v2076_v43 = vpop.f32.mrf.mxu1 }
 0x3cf   : > { %v2077_v45 = vadd.f32 %v2076_v43, %v2048_v22 }
 0x3d3   : > { %v2105_v38 = vpop.f32.mrf.mxu2 }
 0x3d4   : > { %v2106_v57 = vadd.f32 %v2105_v38, %v2077_v45 }
 0x3d6   : > { %2115 = vst [vmem:[%s3390_s30 + $0x38] sm:$0xff] %v2106_v57 }
 0x3d7   : > { %2501 = shalt.err (!%p2498_p11)
}
 0x3d8   : > { %s2572_s20 = smov 128   ;;  %s2573_s30 = smov 256  }
 0x3d9   : > { %s2574_s13 = smov 8  }
 0x3da   : > { %2394 = dma.vmem_to_hbm [thread:$0]  (%p2661_p3), %s2131_s16, 1024, %s2133_s24, %s2117_s17, %s2572_s20, %s2573_s30, %s2574_s13  }
 0x3db PF: > { %p2400_p12 = scmp.ge.s32.totalorder %s2568_s28, 2  ;;  %s2147_s25 = sand.u32 1, %s2540_s21  }
 0x3dc   : > { %s2148_s14 = scalar_lea.sflag [#allocation3], %s2147_s25 }
 0x3dd   : > { %p2397_p13 = pnand %p2400_p12, %p2670_p8 }
 0x3df   : > { %p2398_p0 = pneg %p2397_p13 }
 0x3e1   : > { %2535 = dma.done.wait (%p2398_p0), %s2148_s14, 1024  }
 0x3e2   : > { %2537 = vsyncadd (%p2398_p0), %s2148_s14, 4294966272  ;;  %s19_s28 = sadd.s32 1, %s2568_s28   ;;  %s3463_s10 = sld [smem:[#allocation5_spill]] }
 0x3e3   : > { %p16_p1 = scmp.ge.s32.totalorder %s19_s28, 6   ;;  %s3464_s16 = sld [smem:[#allocation6_spill]] }
 0x3e4   : > { %s3465_s21 = smov %s2544_s22  ;;  %s3466_s22 = smov %s2548_s23 }
 0x3e5   : > { %s3467_s23 = smov %s2679_s15  ;;  %s3468_s24 = smov %s2560_s26 }
 0x3e6   : > { %s3469_s25 = smov %s2564_s27  ;;  %18 = sbr.rel (!%p16_p1) target bundleno = 5 (0x5), region = 96 }
 0x3e8   : > { %s3470_s26 = smov %s3463_s10 }
 0x3e9   : > { %s3471_s27 = smov %s3464_s16 }
 0x3eb   :  { %2154 = vsyncpa [#allocation3], 1 }
 0x3ec   :  { %2156 = vsyncpa [#allocation3 + $0x1], 1 }

</bundles_post_ra>
